<compile_context>
chip_gen: v7x
topology: tpu7x:2x2x1
jax: 0.10.0
libtpu: 0.0.40
codegen_flags: <defaults>
</compile_context>

<pallas_src>
import functools

import jax
import jax.numpy as jnp
from jax.experimental import pallas as pl
from jax.experimental.pallas import tpu as pltpu

# `latent_size` is an undefined global in the original script; we pick 64 so the
# packed [mu | log_var] output is exactly 128 lanes wide (lane-dense stores).
LATENT_SIZE = 64
IN_FEATURES = 784
H1, H2 = 512, 256
TB_MAX = 256  # max batch-tile rows; sweep to 512 on v6e if desired (still fits 32 MiB)


# ---------------------------------------------------------------------------
# Fused Pallas kernel: one batch tile, everything resident in VMEM
# ---------------------------------------------------------------------------
def _vae_fused_kernel(x_ref, eps_ref,
                      ew1, eb1, ew2, eb2, ew3, eb3,
                      dw1, db1, dw2, db2, dw3, db3,
                      mulv_ref, recon_ref):
    f32 = jnp.float32
    bf16 = jnp.bfloat16

    # ---- encoder: Linear(784,512)+ReLU -> Linear(512,256)+ReLU -> Linear(256,2L)
    x = x_ref[...]  # already bfloat16 (cast once in the wrapper)
    h1 = jnp.maximum(jnp.dot(x, ew1[...], preferred_element_type=f32) + eb1[...], 0.0)
    h2 = jnp.maximum(jnp.dot(h1.astype(bf16), ew2[...], preferred_element_type=f32) + eb2[...], 0.0)
    h = jnp.dot(h2.astype(bf16), ew3[...], preferred_element_type=f32) + eb3[...]  # (TB, 2L) f32
    mulv_ref[...] = h  # packed [mu | log_var]; lane-dense when 2L == 128

    # ---- reparameterize: z = eps * exp(0.5*log_var) + mu   (torch.chunk order)
    L = h.shape[1] // 2
    mu = h[:, :L]
    log_var = h[:, L:]
    z = eps_ref[...] * jnp.exp(0.5 * log_var) + mu  # f32, VPU/EUP

    # ---- decoder: Linear(L,256)+ReLU -> Linear(256,512)+ReLU -> Linear(512,784)+Sigmoid
    d1 = jnp.maximum(jnp.dot(z.astype(bf16), dw1[...], preferred_element_type=f32) + db1[...], 0.0)
    d2 = jnp.maximum(jnp.dot(d1.astype(bf16), dw2[...], preferred_element_type=f32) + db2[...], 0.0)
    logits = jnp.dot(d2.astype(bf16), dw3[...], preferred_element_type=f32) + db3[...]
    recon_ref[...] = jax.nn.sigmoid(logits).astype(recon_ref.dtype)  # bf16 writeback


# ---------------------------------------------------------------------------
# Wrapper: batch grid, resident weights, packed mu/log_var split here
# ---------------------------------------------------------------------------
def _round_up(n, m):
    return ((n + m - 1) // m) * m


def _choose_batch_tile(batch):
    # Target >= 2 batch tiles (so v7x's two TensorCores both get work) while
    # keeping tiles bf16-sublane friendly (multiples of 16) and capped so the
    # double-buffered working set stays inside every generation's VMEM budget.
    tb = min(TB_MAX, _round_up((batch + 1) // 2, 16))
    if tb >= batch:
        tb = batch  # single full-array tile; full-dim blocks are always legal
    return tb


@functools.partial(jax.jit, static_argnames=("latent_size",))
def vae_forward(x, eps, enc_params, dec_params, latent_size=LATENT_SIZE):
    B = x.shape[0]
    # x.view(-1, 784); cast to bf16 once here so the kernel's biggest input
    # stream is half the bytes (the MXU consumes bf16 anyway).
    x_flat = x.reshape(B, IN_FEATURES).astype(jnp.bfloat16)
    eps = eps.astype(jnp.float32)

    tb = _choose_batch_tile(B)
    grid = (pl.cdiv(B, tb),)  # last tile may be partial; Pallas clips the DMAs

    def row_spec(cols):
        return pl.BlockSpec((tb, cols), lambda i: (i, 0))

    def resident(arr):  # weights/biases: same block every step -> stays in VMEM
        return pl.BlockSpec(arr.shape, lambda i: (0, 0))

    params = tuple(enc_params) + tuple(dec_params)
    in_specs = [row_spec(IN_FEATURES), row_spec(latent_size)] + [resident(p) for p in params]
    out_specs = (row_spec(2 * latent_size), row_spec(IN_FEATURES))
    out_shape = (
        jax.ShapeDtypeStruct((B, 2 * latent_size), jnp.float32),
        jax.ShapeDtypeStruct((B, IN_FEATURES), jnp.bfloat16),
    )

    mulv, recon = pl.pallas_call(
        _vae_fused_kernel,
        grid=grid,
        in_specs=in_specs,
        out_specs=out_specs,
        out_shape=out_shape,
        compiler_params=pltpu.CompilerParams(
            dimension_semantics=("parallel",),  # batch tiles independent -> both TCs on v7x
        ),
    )(x_flat, eps, *params)

    mu = mulv[:, :latent_size]
    log_var = mulv[:, latent_size:]
    return recon, mu, log_var


# ---------------------------------------------------------------------------
# Parameter init (deterministic, PyTorch Linear-style uniform); weights bf16
# ---------------------------------------------------------------------------
def _init_linear(key, fan_in, fan_out):
    kw, kb = jax.random.split(key)
    bound = 1.0 / (fan_in ** 0.5)
    # NOTE: weights are bf16 (native MXU path, half the weight DMA); this is the
    # intended numerical contract (vs. the f32 PyTorch module).
    w = jax.random.uniform(kw, (fan_in, fan_out), jnp.float32, -bound, bound).astype(jnp.bfloat16)
    b = jax.random.uniform(kb, (1, fan_out), jnp.float32, -bound, bound)  # bias stays f32
    return w, b


def init_vae_params(key, latent_size=LATENT_SIZE):
    keys = jax.random.split(key, 6)
    enc = []
    for k, (fi, fo) in zip(keys[:3], [(IN_FEATURES, H1), (H1, H2), (H2, 2 * latent_size)]):
        enc.extend(_init_linear(k, fi, fo))
    dec = []
    for k, (fi, fo) in zip(keys[3:], [(latent_size, H2), (H2, H1), (H1, IN_FEATURES)]):
        dec.extend(_init_linear(k, fi, fo))
    return tuple(enc), tuple(dec)


# ---------------------------------------------------------------------------
# Pure-JAX reference (mirrors the kernel's bf16-weight / f32-accumulate math)
# ---------------------------------------------------------------------------
def _ref_forward(x, eps, enc_params, dec_params, latent_size):
    def lin(a, w, b):
        return jnp.dot(a.astype(jnp.bfloat16), w, preferred_element_type=jnp.float32) + b

    ew1, eb1, ew2, eb2, ew3, eb3 = enc_params
    dw1, db1, dw2, db2, dw3, db3 = dec_params
    xf = x.reshape(x.shape[0], -1).astype(jnp.float32)
    h1 = jnp.maximum(lin(xf, ew1, eb1), 0.0)
    h2 = jnp.maximum(lin(h1, ew2, eb2), 0.0)
    h = lin(h2, ew3, eb3)
    mu, log_var = h[:, :latent_size], h[:, latent_size:]
    z = eps * jnp.exp(0.5 * log_var) + mu
    d1 = jnp.maximum(lin(z, dw1, db1), 0.0)
    d2 = jnp.maximum(lin(d1, dw2, db2), 0.0)
    return jax.nn.sigmoid(lin(d2, dw3, db3)), mu, log_var


if __name__ == "__main__":
    key = jax.random.PRNGKey(0)
    k_x, k_eps, k_param = jax.random.split(key, 3)

    B = 8
    x = jax.random.normal(k_x, (B, 1, 28, 28), jnp.float32)        # NCHW, viewed to (B, 784)
    eps = jax.random.normal(k_eps, (B, LATENT_SIZE), jnp.float32)  # torch.randn_like(std)

    enc_params, dec_params = init_vae_params(k_param, LATENT_SIZE)

    recon, mu, log_var = vae_forward(x, eps, enc_params, dec_params, latent_size=LATENT_SIZE)
    jax.block_until_ready((recon, mu, log_var))

    assert recon.shape == (B, IN_FEATURES)
    assert mu.shape == (B, LATENT_SIZE)
    assert log_var.shape == (B, LATENT_SIZE)
    assert bool(jnp.all(jnp.isfinite(recon.astype(jnp.float32))))

    r_ref, mu_ref, lv_ref = _ref_forward(x, eps, enc_params, dec_params, LATENT_SIZE)
    assert bool(jnp.allclose(recon.astype(jnp.float32), r_ref, atol=2e-2, rtol=2e-2))
    assert bool(jnp.allclose(mu, mu_ref, atol=2e-2, rtol=2e-2))
    assert bool(jnp.allclose(log_var, lv_ref, atol=2e-2, rtol=2e-2))

    print("KERNEL_OK")
</pallas_src>

<mosaic_0001>
module attributes {stable_mosaic.version = 11 : i64} {
  func.func @_vae_fused_kernel(%arg0: i32, %arg1: memref<8x784xbf16, #tpu.memory_space<vmem>>, %arg2: memref<8x64xf32, #tpu.memory_space<vmem>>, %arg3: memref<784x512xbf16, #tpu.memory_space<vmem>>, %arg4: memref<1x512xf32, #tpu.memory_space<vmem>>, %arg5: memref<512x256xbf16, #tpu.memory_space<vmem>>, %arg6: memref<1x256xf32, #tpu.memory_space<vmem>>, %arg7: memref<256x128xbf16, #tpu.memory_space<vmem>>, %arg8: memref<1x128xf32, #tpu.memory_space<vmem>>, %arg9: memref<64x256xbf16, #tpu.memory_space<vmem>>, %arg10: memref<1x256xf32, #tpu.memory_space<vmem>>, %arg11: memref<256x512xbf16, #tpu.memory_space<vmem>>, %arg12: memref<1x512xf32, #tpu.memory_space<vmem>>, %arg13: memref<512x784xbf16, #tpu.memory_space<vmem>>, %arg14: memref<1x784xf32, #tpu.memory_space<vmem>>, %arg15: memref<8x128xf32, #tpu.memory_space<vmem>>, %arg16: memref<8x784xbf16, #tpu.memory_space<vmem>>) attributes {dimension_semantics = [#tpu.dimension_semantics<parallel>], iteration_bounds = array<i64: 1>, scalar_prefetch = 0 : i64, scratch_operands = 0 : i64, tpu.core_type = #tpu.core_type<tc>, window_params = [{transform_indices = @transform_0, window_bounds = array<i64: 8, 784>}, {transform_indices = @transform_1, window_bounds = array<i64: 8, 64>}, {pipeline_mode = #tpu.pipeline_mode<synchronous>, transform_indices = @transform_2, window_bounds = array<i64: 784, 512>}, {pipeline_mode = #tpu.pipeline_mode<synchronous>, transform_indices = @transform_3, window_bounds = array<i64: 1, 512>}, {pipeline_mode = #tpu.pipeline_mode<synchronous>, transform_indices = @transform_4, window_bounds = array<i64: 512, 256>}, {pipeline_mode = #tpu.pipeline_mode<synchronous>, transform_indices = @transform_5, window_bounds = array<i64: 1, 256>}, {pipeline_mode = #tpu.pipeline_mode<synchronous>, transform_indices = @transform_6, window_bounds = array<i64: 256, 128>}, {pipeline_mode = #tpu.pipeline_mode<synchronous>, transform_indices = @transform_7, window_bounds = array<i64: 1, 128>}, {pipeline_mode = #tpu.pipeline_mode<synchronous>, transform_indices = @transform_8, window_bounds = array<i64: 64, 256>}, {pipeline_mode = #tpu.pipeline_mode<synchronous>, transform_indices = @transform_9, window_bounds = array<i64: 1, 256>}, {pipeline_mode = #tpu.pipeline_mode<synchronous>, transform_indices = @transform_10, window_bounds = array<i64: 256, 512>}, {pipeline_mode = #tpu.pipeline_mode<synchronous>, transform_indices = @transform_11, window_bounds = array<i64: 1, 512>}, {pipeline_mode = #tpu.pipeline_mode<synchronous>, transform_indices = @transform_12, window_bounds = array<i64: 512, 784>}, {pipeline_mode = #tpu.pipeline_mode<synchronous>, transform_indices = @transform_13, window_bounds = array<i64: 1, 784>}, {transform_indices = @transform_14, window_bounds = array<i64: 8, 128>}, {transform_indices = @transform_15, window_bounds = array<i64: 8, 784>}]} {
    %c0 = arith.constant 0 : index
    %c0_0 = arith.constant 0 : index
    %0 = vector.load %arg1[%c0, %c0_0] : memref<8x784xbf16, #tpu.memory_space<vmem>>, vector<8x784xbf16>
    %c0_1 = arith.constant 0 : index
    %c0_2 = arith.constant 0 : index
    %1 = vector.load %arg3[%c0_1, %c0_2] : memref<784x512xbf16, #tpu.memory_space<vmem>>, vector<784x512xbf16>
    %cst = arith.constant dense<0.000000e+00> : vector<8x512xf32>
    %2 = tpu.matmul %0, %1, %cst {dimension_numbers = #tpu.dot_dimension_numbers<[1], [0], [0], [1], [0, 0, 1, 1], [], []>} : vector<8x784xbf16>, vector<784x512xbf16>, vector<8x512xf32> -> vector<8x512xf32>
    %c0_3 = arith.constant 0 : index
    %c0_4 = arith.constant 0 : index
    %3 = vector.load %arg4[%c0_3, %c0_4] : memref<1x512xf32, #tpu.memory_space<vmem>>, vector<1x512xf32>
    %4 = vector.broadcast %3 : vector<1x512xf32> to vector<8x512xf32>
    %5 = arith.addf %2, %4 : vector<8x512xf32>
    %cst_5 = arith.constant 0.000000e+00 : f32
    %6 = vector.broadcast %cst_5 : f32 to vector<8x512xf32>
    %7 = arith.maximumf %5, %6 : vector<8x512xf32>
    %8 = arith.truncf %7 : vector<8x512xf32> to vector<8x512xbf16>
    %c0_6 = arith.constant 0 : index
    %c0_7 = arith.constant 0 : index
    %9 = vector.load %arg5[%c0_6, %c0_7] : memref<512x256xbf16, #tpu.memory_space<vmem>>, vector<512x256xbf16>
    %cst_8 = arith.constant dense<0.000000e+00> : vector<8x256xf32>
    %10 = tpu.matmul %8, %9, %cst_8 {dimension_numbers = #tpu.dot_dimension_numbers<[1], [0], [0], [1], [0, 0, 1, 1], [], []>} : vector<8x512xbf16>, vector<512x256xbf16>, vector<8x256xf32> -> vector<8x256xf32>
    %c0_9 = arith.constant 0 : index
    %c0_10 = arith.constant 0 : index
    %11 = vector.load %arg6[%c0_9, %c0_10] : memref<1x256xf32, #tpu.memory_space<vmem>>, vector<1x256xf32>
    %12 = vector.broadcast %11 : vector<1x256xf32> to vector<8x256xf32>
    %13 = arith.addf %10, %12 : vector<8x256xf32>
    %cst_11 = arith.constant 0.000000e+00 : f32
    %14 = vector.broadcast %cst_11 : f32 to vector<8x256xf32>
    %15 = arith.maximumf %13, %14 : vector<8x256xf32>
    %16 = arith.truncf %15 : vector<8x256xf32> to vector<8x256xbf16>
    %c0_12 = arith.constant 0 : index
    %c0_13 = arith.constant 0 : index
    %17 = vector.load %arg7[%c0_12, %c0_13] : memref<256x128xbf16, #tpu.memory_space<vmem>>, vector<256x128xbf16>
    %cst_14 = arith.constant dense<0.000000e+00> : vector<8x128xf32>
    %18 = tpu.matmul %16, %17, %cst_14 {dimension_numbers = #tpu.dot_dimension_numbers<[1], [0], [0], [1], [0, 0, 1, 1], [], []>} : vector<8x256xbf16>, vector<256x128xbf16>, vector<8x128xf32> -> vector<8x128xf32>
    %c0_15 = arith.constant 0 : index
    %c0_16 = arith.constant 0 : index
    %19 = vector.load %arg8[%c0_15, %c0_16] : memref<1x128xf32, #tpu.memory_space<vmem>>, vector<1x128xf32>
    %20 = vector.broadcast %19 : vector<1x128xf32> to vector<8x128xf32>
    %21 = arith.addf %18, %20 : vector<8x128xf32>
    %c0_17 = arith.constant 0 : index
    %c0_18 = arith.constant 0 : index
    %22 = vector.load %arg15[%c0_17, %c0_18] : memref<8x128xf32, #tpu.memory_space<vmem>>, vector<8x128xf32>
    tpu.vector_store %arg15[%c0_17, %c0_18], %21 {strides = array<i32>} : memref<8x128xf32, #tpu.memory_space<vmem>>, vector<8x128xf32>,
    %23 = vector.extract_strided_slice %21 {offsets = [0, 0], sizes = [8, 64], strides = [1, 1]} : vector<8x128xf32> to vector<8x64xf32>
    %24 = vector.extract_strided_slice %21 {offsets = [0, 64], sizes = [8, 64], strides = [1, 1]} : vector<8x128xf32> to vector<8x64xf32>
    %c0_19 = arith.constant 0 : index
    %c0_20 = arith.constant 0 : index
    %25 = vector.load %arg2[%c0_19, %c0_20] : memref<8x64xf32, #tpu.memory_space<vmem>>, vector<8x64xf32>
    %cst_21 = arith.constant 5.000000e-01 : f32
    %26 = vector.broadcast %cst_21 : f32 to vector<8x64xf32>
    %27 = arith.mulf %26, %24 : vector<8x64xf32>
    %28 = math.exp %27 : vector<8x64xf32>
    %29 = arith.mulf %25, %28 : vector<8x64xf32>
    %30 = arith.addf %29, %23 : vector<8x64xf32>
    %31 = arith.truncf %30 : vector<8x64xf32> to vector<8x64xbf16>
    %c0_22 = arith.constant 0 : index
    %c0_23 = arith.constant 0 : index
    %32 = vector.load %arg9[%c0_22, %c0_23] : memref<64x256xbf16, #tpu.memory_space<vmem>>, vector<64x256xbf16>
    %cst_24 = arith.constant dense<0.000000e+00> : vector<8x256xf32>
    %33 = tpu.matmul %31, %32, %cst_24 {dimension_numbers = #tpu.dot_dimension_numbers<[1], [0], [0], [1], [0, 0, 1, 1], [], []>} : vector<8x64xbf16>, vector<64x256xbf16>, vector<8x256xf32> -> vector<8x256xf32>
    %c0_25 = arith.constant 0 : index
    %c0_26 = arith.constant 0 : index
    %34 = vector.load %arg10[%c0_25, %c0_26] : memref<1x256xf32, #tpu.memory_space<vmem>>, vector<1x256xf32>
    %35 = vector.broadcast %34 : vector<1x256xf32> to vector<8x256xf32>
    %36 = arith.addf %33, %35 : vector<8x256xf32>
    %cst_27 = arith.constant 0.000000e+00 : f32
    %37 = vector.broadcast %cst_27 : f32 to vector<8x256xf32>
    %38 = arith.maximumf %36, %37 : vector<8x256xf32>
    %39 = arith.truncf %38 : vector<8x256xf32> to vector<8x256xbf16>
    %c0_28 = arith.constant 0 : index
    %c0_29 = arith.constant 0 : index
    %40 = vector.load %arg11[%c0_28, %c0_29] : memref<256x512xbf16, #tpu.memory_space<vmem>>, vector<256x512xbf16>
    %cst_30 = arith.constant dense<0.000000e+00> : vector<8x512xf32>
    %41 = tpu.matmul %39, %40, %cst_30 {dimension_numbers = #tpu.dot_dimension_numbers<[1], [0], [0], [1], [0, 0, 1, 1], [], []>} : vector<8x256xbf16>, vector<256x512xbf16>, vector<8x512xf32> -> vector<8x512xf32>
    %c0_31 = arith.constant 0 : index
    %c0_32 = arith.constant 0 : index
    %42 = vector.load %arg12[%c0_31, %c0_32] : memref<1x512xf32, #tpu.memory_space<vmem>>, vector<1x512xf32>
    %43 = vector.broadcast %42 : vector<1x512xf32> to vector<8x512xf32>
    %44 = arith.addf %41, %43 : vector<8x512xf32>
    %cst_33 = arith.constant 0.000000e+00 : f32
    %45 = vector.broadcast %cst_33 : f32 to vector<8x512xf32>
    %46 = arith.maximumf %44, %45 : vector<8x512xf32>
    %47 = arith.truncf %46 : vector<8x512xf32> to vector<8x512xbf16>
    %c0_34 = arith.constant 0 : index
    %c0_35 = arith.constant 0 : index
    %48 = vector.load %arg13[%c0_34, %c0_35] : memref<512x784xbf16, #tpu.memory_space<vmem>>, vector<512x784xbf16>
    %cst_36 = arith.constant dense<0.000000e+00> : vector<8x784xf32>
    %49 = tpu.matmul %47, %48, %cst_36 {dimension_numbers = #tpu.dot_dimension_numbers<[1], [0], [0], [1], [0, 0, 1, 1], [], []>} : vector<8x512xbf16>, vector<512x784xbf16>, vector<8x784xf32> -> vector<8x784xf32>
    %c0_37 = arith.constant 0 : index
    %c0_38 = arith.constant 0 : index
    %50 = vector.load %arg14[%c0_37, %c0_38] : memref<1x784xf32, #tpu.memory_space<vmem>>, vector<1x784xf32>
    %51 = vector.broadcast %50 : vector<1x784xf32> to vector<8x784xf32>
    %52 = arith.addf %49, %51 : vector<8x784xf32>
    %53 = arith.negf %52 : vector<8x784xf32>
    %54 = math.exp %53 : vector<8x784xf32>
    %cst_39 = arith.constant 1.000000e+00 : f32
    %55 = vector.broadcast %cst_39 : f32 to vector<8x784xf32>
    %56 = arith.addf %55, %54 : vector<8x784xf32>
    %57 = arith.divf %55, %56 : vector<8x784xf32>
    %58 = arith.truncf %57 : vector<8x784xf32> to vector<8x784xbf16>
    %c0_40 = arith.constant 0 : index
    %c0_41 = arith.constant 0 : index
    %59 = vector.load %arg16[%c0_40, %c0_41] : memref<8x784xbf16, #tpu.memory_space<vmem>>, vector<8x784xbf16>
    tpu.vector_store %arg16[%c0_40, %c0_41], %58 {strides = array<i32>} : memref<8x784xbf16, #tpu.memory_space<vmem>>, vector<8x784xbf16>,
    return
  }
  func.func @transform_0(%arg0: i32) -> (i32, i32) {
    %c0_i32 = arith.constant 0 : i32
    %c0_i32_0 = arith.constant 0 : i32
    return %arg0, %c0_i32 : i32, i32
  }
  func.func @transform_1(%arg0: i32) -> (i32, i32) {
    %c0_i32 = arith.constant 0 : i32
    %c0_i32_0 = arith.constant 0 : i32
    return %arg0, %c0_i32 : i32, i32
  }
  func.func @transform_2(%arg0: i32) -> (i32, i32) {
    %c0_i32 = arith.constant 0 : i32
    %c0_i32_0 = arith.constant 0 : i32
    %c0_i32_1 = arith.constant 0 : i32
    return %c0_i32, %c0_i32_0 : i32, i32
  }
  func.func @transform_3(%arg0: i32) -> (i32, i32) {
    %c0_i32 = arith.constant 0 : i32
    %c0_i32_0 = arith.constant 0 : i32
    %c0_i32_1 = arith.constant 0 : i32
    return %c0_i32, %c0_i32_0 : i32, i32
  }
  func.func @transform_4(%arg0: i32) -> (i32, i32) {
    %c0_i32 = arith.constant 0 : i32
    %c0_i32_0 = arith.constant 0 : i32
    %c0_i32_1 = arith.constant 0 : i32
    return %c0_i32, %c0_i32_0 : i32, i32
  }
  func.func @transform_5(%arg0: i32) -> (i32, i32) {
    %c0_i32 = arith.constant 0 : i32
    %c0_i32_0 = arith.constant 0 : i32
    %c0_i32_1 = arith.constant 0 : i32
    return %c0_i32, %c0_i32_0 : i32, i32
  }
  func.func @transform_6(%arg0: i32) -> (i32, i32) {
    %c0_i32 = arith.constant 0 : i32
    %c0_i32_0 = arith.constant 0 : i32
    %c0_i32_1 = arith.constant 0 : i32
    return %c0_i32, %c0_i32_0 : i32, i32
  }
  func.func @transform_7(%arg0: i32) -> (i32, i32) {
    %c0_i32 = arith.constant 0 : i32
    %c0_i32_0 = arith.constant 0 : i32
    %c0_i32_1 = arith.constant 0 : i32
    return %c0_i32, %c0_i32_0 : i32, i32
  }
  func.func @transform_8(%arg0: i32) -> (i32, i32) {
    %c0_i32 = arith.constant 0 : i32
    %c0_i32_0 = arith.constant 0 : i32
    %c0_i32_1 = arith.constant 0 : i32
    return %c0_i32, %c0_i32_0 : i32, i32
  }
  func.func @transform_9(%arg0: i32) -> (i32, i32) {
    %c0_i32 = arith.constant 0 : i32
    %c0_i32_0 = arith.constant 0 : i32
    %c0_i32_1 = arith.constant 0 : i32
    return %c0_i32, %c0_i32_0 : i32, i32
  }
  func.func @transform_10(%arg0: i32) -> (i32, i32) {
    %c0_i32 = arith.constant 0 : i32
    %c0_i32_0 = arith.constant 0 : i32
    %c0_i32_1 = arith.constant 0 : i32
    return %c0_i32, %c0_i32_0 : i32, i32
  }
  func.func @transform_11(%arg0: i32) -> (i32, i32) {
    %c0_i32 = arith.constant 0 : i32
    %c0_i32_0 = arith.constant 0 : i32
    %c0_i32_1 = arith.constant 0 : i32
    return %c0_i32, %c0_i32_0 : i32, i32
  }
  func.func @transform_12(%arg0: i32) -> (i32, i32) {
    %c0_i32 = arith.constant 0 : i32
    %c0_i32_0 = arith.constant 0 : i32
    %c0_i32_1 = arith.constant 0 : i32
    return %c0_i32, %c0_i32_0 : i32, i32
  }
  func.func @transform_13(%arg0: i32) -> (i32, i32) {
    %c0_i32 = arith.constant 0 : i32
    %c0_i32_0 = arith.constant 0 : i32
    %c0_i32_1 = arith.constant 0 : i32
    return %c0_i32, %c0_i32_0 : i32, i32
  }
  func.func @transform_14(%arg0: i32) -> (i32, i32) {
    %c0_i32 = arith.constant 0 : i32
    %c0_i32_0 = arith.constant 0 : i32
    return %arg0, %c0_i32 : i32, i32
  }
  func.func @transform_15(%arg0: i32) -> (i32, i32) {
    %c0_i32 = arith.constant 0 : i32
    %c0_i32_0 = arith.constant 0 : i32
    return %arg0, %c0_i32 : i32, i32
  }
}

</mosaic_0001>

<bundles_post_ra>
// kernel: vae_forward.1
= control target key start
LH: loop header
LB: loop body
LE: loop exit
PB: predicated region body
PF: predicated region fallthrough
CT: control target
= control target key end

     0   :  { %v6369_v2 = vmov 0   ;;  %vm1277_vm0 = vcmask 130048   ;;  %s8324_s0 = inlined_call_operand.vmem [shape: bf16[8,784], index: 0, kind: input, shape index: {}]   ;;  %s8325_s1 = inlined_call_operand.vmem [shape: f32[8,64], index: 1, kind: input, shape index: {}]   ;;  %s8326_s2 = inlined_call_operand.vmem [shape: bf16[784,512], index: 2, kind: input, shape index: {}]   ;;  %s8327_s3 = inlined_call_operand.vmem [shape: f32[1,512], index: 3, kind: input, shape index: {}]   ;;  %s8328_s4 = inlined_call_operand.vmem [shape: bf16[512,256], index: 4, kind: input, shape index: {}]   ;;  %s8329_s5 = inlined_call_operand.vmem [shape: f32[1,256], index: 5, kind: input, shape index: {}]   ;;  %s8330_s6 = inlined_call_operand.vmem [shape: bf16[256,128], index: 6, kind: input, shape index: {}]   ;;  %s8331_s7 = inlined_call_operand.vmem [shape: f32[1,128], index: 7, kind: input, shape index: {}]   ;;  %s8332_s8 = inlined_call_operand.vmem [shape: bf16[64,256], index: 8, kind: input, shape index: {}]   ;;  %s8333_s9 = inlined_call_operand.vmem [shape: f32[1,256], index: 9, kind: input, shape index: {}]   ;;  %s8334_s10 = inlined_call_operand.vmem [shape: bf16[256,512], index: 10, kind: input, shape index: {}]   ;;  %s8335_s11 = inlined_call_operand.vmem [shape: f32[1,512], index: 11, kind: input, shape index: {}]   ;;  %s8336_s12 = inlined_call_operand.vmem [shape: bf16[512,784], index: 12, kind: input, shape index: {}]   ;;  %s8337_s13 = inlined_call_operand.vmem [shape: f32[1,784], index: 13, kind: input, shape index: {}]   ;;  %s8338_s14 = inlined_call_operand.vmem [shape: f32[8,128], index: 14, kind: output, shape index: {0}]   ;;  %s8339_s15 = inlined_call_operand.hbm [shape: bf16[8,784], index: 15, kind: output, shape index: {1}]  }
   0x1   :  { %v5473_v0 = vld [vmem:[%s8326_s2 + $0x4] ss:$16 sps:$4 sm:$0xff]   ;;  %1436 = vmatprep.mubr.bf16.mxu1 %v6369_v2  ;;  %v5477_v3 = vld [vmem:[%s8326_s2] ss:$16 sps:$4 sm:$0xff]   ;;  %v5481_v6 = vld [vmem:[%s8326_s2 + $0x8] ss:$16 sps:$4 sm:$0xff]  }
   0x2   :  { %v5475_v1 = vld [vmem:[%s8326_s2 + $0x604] ss:$16 sps:$4 sm:$0xff]   ;;  %1281 = vmatprep.subr.bf16.mxu0 %v5473_v0  ;;  %v5478_v4 = vld [vmem:[%s8326_s2 + $0x600] ss:$16 sps:$4 sm:$0xff]   ;;  %v5483_v7 = vld [vmem:[%s8326_s2 + $0xc] ss:$16 sps:$4 sm:$0xff]  }
   0x3   :  { %1404 = vmatprep.subr.bf16.mxu1 %v5475_v1  ;;  %v5479_v5 = vld [vmem:[%s8326_s2 + $0x24] ss:$16 sps:$4 sm:$0xff]   ;;  %1282 = vmatpush1.bf16.msra.mxu0 %v5477_v3  ;;  %v5484_v8 = vld [vmem:[%s8326_s2 + $0x20] ss:$16 sps:$4 sm:$0xff]   ;;  %v5485_v9 = vld [vmem:[%s8324_s0 + $0x18] ss:$0 sps:$4 sm:$0xff]  }
   0x4   :  { %1405 = vmatpush1.bf16.msra.mxu1 %v5478_v4  ;;  %1283 = vmatprep.subr.bf16.mxu0 %v5479_v5  ;;  %v5486_v10 = vld [vmem:[%s8326_s2 + $0x44] ss:$16 sps:$4 sm:$0xff]   ;;  %v5488_v11 = vld [vmem:[%s8326_s2 + $0x28] ss:$16 sps:$4 sm:$0xff]   ;;  %v5490_v12 = vld [vmem:[%s8326_s2 + $0x2c] ss:$16 sps:$4 sm:$0xff]  }
   0x5   :  { %1445 = vmatprep.subr.bf16.mxu1 %v5483_v7  ;;  %v5491_v13 = vld [vmem:[%s8326_s2 + $0x40] ss:$16 sps:$4 sm:$0xff]   ;;  %v5492_v14 = vld [vmem:[%s8326_s2 + $0x64] ss:$16 sps:$4 sm:$0xff]   ;;  %v5496_v15 = vld [vmem:[%s8326_s2 + $0x4c] ss:$16 sps:$4 sm:$0xff]  }
   0x6   :  { %v5494_v16 = vld [vmem:[%s8326_s2 + $0x48] ss:$16 sps:$4 sm:$0xff]   ;;  %v5497_v17 = vld [vmem:[%s8326_s2 + $0x60] ss:$16 sps:$4 sm:$0xff]   ;;  %v5498_v18 = vld [vmem:[%s8326_s2 + $0x84] ss:$16 sps:$4 sm:$0xff]  }
   0x7   :  { %4959 = vmatmul.mubr.msk.bf16.vlgmr.msra.gmra.mrb[0].mxu1 %vm1277_vm0, %v5485_v9  ;;  %1284 = vmatpush1.bf16.msra.mxu0 %v5484_v8  ;;  %v5502_v19 = vld [vmem:[%s8326_s2 + $0x6c] ss:$16 sps:$4 sm:$0xff]   ;;  %v5500_v20 = vld [vmem:[%s8326_s2 + $0x68] ss:$16 sps:$4 sm:$0xff]   ;;  %v5503_v21 = vld [vmem:[%s8326_s2 + $0x80] ss:$16 sps:$4 sm:$0xff]  }
   0x8   :  { %1446 = vmatpush1.bf16.msra.mxu1 %v5481_v6  ;;  %1285 = vmatprep.subr.bf16.mxu0 %v5486_v10  ;;  %v5504_v22 = vld [vmem:[%s8326_s2 + $0xa4] ss:$16 sps:$4 sm:$0xff]   ;;  %v5508_v23 = vld [vmem:[%s8326_s2 + $0x8c] ss:$16 sps:$4 sm:$0xff]   ;;  %v5506_v24 = vld [vmem:[%s8326_s2 + $0x88] ss:$16 sps:$4 sm:$0xff]  }
   0x9   :  { %1447 = vmatprep.subr.bf16.mxu1 %v5490_v12  ;;  %v5509_v25 = vld [vmem:[%s8326_s2 + $0xa0] ss:$16 sps:$4 sm:$0xff]   ;;  %v5510_v26 = vld [vmem:[%s8326_s2 + $0xc4] ss:$16 sps:$4 sm:$0xff]   ;;  %v5514_v27 = vld [vmem:[%s8326_s2 + $0xac] ss:$16 sps:$4 sm:$0xff]  }
   0xa   :  { %v5512_v28 = vld [vmem:[%s8326_s2 + $0xa8] ss:$16 sps:$4 sm:$0xff]   ;;  %v5515_v29 = vld [vmem:[%s8326_s2 + $0xc0] ss:$16 sps:$4 sm:$0xff]   ;;  %v5516_v30 = vld [vmem:[%s8326_s2 + $0xe4] ss:$16 sps:$4 sm:$0xff]  }
   0xb   :  { %1286 = vmatpush1.bf16.msra.mxu0 %v5491_v13  ;;  %v5520_v31 = vld [vmem:[%s8326_s2 + $0xcc] ss:$16 sps:$4 sm:$0xff]   ;;  %v5518_v32 = vld [vmem:[%s8326_s2 + $0xc8] ss:$16 sps:$4 sm:$0xff]   ;;  %v5521_v33 = vld [vmem:[%s8326_s2 + $0xe0] ss:$16 sps:$4 sm:$0xff]  }
   0xc   :  { %1448 = vmatpush1.bf16.msra.mxu1 %v5488_v11  ;;  %1287 = vmatprep.subr.bf16.mxu0 %v5492_v14  ;;  %v5522_v34 = vld [vmem:[%s8326_s2 + $0x104] ss:$16 sps:$4 sm:$0xff]   ;;  %v5526_v35 = vld [vmem:[%s8326_s2 + $0xec] ss:$16 sps:$4 sm:$0xff]   ;;  %v5524_v36 = vld [vmem:[%s8326_s2 + $0xe8] ss:$16 sps:$4 sm:$0xff]  }
   0xd   :  { %1449 = vmatprep.subr.bf16.mxu1 %v5496_v15  ;;  %v5527_v37 = vld [vmem:[%s8326_s2 + $0x100] ss:$16 sps:$4 sm:$0xff]   ;;  %v5528_v38 = vld [vmem:[%s8326_s2 + $0x124] ss:$16 sps:$4 sm:$0xff]   ;;  %v5532_v39 = vld [vmem:[%s8326_s2 + $0x10c] ss:$16 sps:$4 sm:$0xff]  }
   0xe   :  { %v5530_v40 = vld [vmem:[%s8326_s2 + $0x108] ss:$16 sps:$4 sm:$0xff]   ;;  %v5533_v41 = vld [vmem:[%s8326_s2 + $0x120] ss:$16 sps:$4 sm:$0xff]   ;;  %v5534_v42 = vld [vmem:[%s8326_s2 + $0x144] ss:$16 sps:$4 sm:$0xff]  }
   0xf   :  { %1288 = vmatpush1.bf16.msra.mxu0 %v5497_v17  ;;  %v5538_v43 = vld [vmem:[%s8326_s2 + $0x12c] ss:$16 sps:$4 sm:$0xff]   ;;  %v5536_v44 = vld [vmem:[%s8326_s2 + $0x128] ss:$16 sps:$4 sm:$0xff]   ;;  %v5539_v45 = vld [vmem:[%s8326_s2 + $0x140] ss:$16 sps:$4 sm:$0xff]  }
  0x10   :  { %1450 = vmatpush1.bf16.msra.mxu1 %v5494_v16  ;;  %1289 = vmatprep.subr.bf16.mxu0 %v5498_v18  ;;  %v5540_v46 = vld [vmem:[%s8326_s2 + $0x164] ss:$16 sps:$4 sm:$0xff]   ;;  %v5544_v47 = vld [vmem:[%s8326_s2 + $0x14c] ss:$16 sps:$4 sm:$0xff]   ;;  %v5542_v48 = vld [vmem:[%s8326_s2 + $0x148] ss:$16 sps:$4 sm:$0xff]  }
  0x11   :  { %1451 = vmatprep.subr.bf16.mxu1 %v5502_v19  ;;  %v51_v49 = vld [vmem:[%s8324_s0] sm:$0xff]  ;;  %v5550_v53 = vld [vmem:[%s8326_s2 + $0x16c] ss:$16 sps:$4 sm:$0xff]   ;;  %v5548_v54 = vld [vmem:[%s8326_s2 + $0x168] ss:$16 sps:$4 sm:$0xff]  }
  0x12   :  { %v5545_v50 = vld [vmem:[%s8326_s2 + $0x160] ss:$16 sps:$4 sm:$0xff]   ;;  %v5546_v51 = vld [vmem:[%s8326_s2 + $0x184] ss:$16 sps:$4 sm:$0xff]   ;;  %v4757_v52 = vcombine.high %v51_v49, %v51_v49  ;;  %v5556_v57 = vld [vmem:[%s8326_s2 + $0x18c] ss:$16 sps:$4 sm:$0xff]   ;;  %v4756_v7 = vcombine.low %v51_v49, %v51_v49 }
  0x13   :  { %1290 = vmatpush1.bf16.msra.mxu0 %v5503_v21  ;;  %v5551_v55 = vld [vmem:[%s8326_s2 + $0x180] ss:$16 sps:$4 sm:$0xff]   ;;  %v5552_v56 = vld [vmem:[%s8326_s2 + $0x1a4] ss:$16 sps:$4 sm:$0xff]   ;;  %v5554_v58 = vld [vmem:[%s8326_s2 + $0x188] ss:$16 sps:$4 sm:$0xff]  }
  0x14   :  { %1452 = vmatpush1.bf16.msra.mxu1 %v5500_v20  ;;  %1291 = vmatprep.subr.bf16.mxu0 %v5504_v22  ;;  %v5557_v59 = vld [vmem:[%s8326_s2 + $0x1a0] ss:$16 sps:$4 sm:$0xff]   ;;  %v5558_v60 = vld [vmem:[%s8326_s2 + $0x1c4] ss:$16 sps:$4 sm:$0xff]   ;;  %v5562_v61 = vld [vmem:[%s8326_s2 + $0x1ac] ss:$16 sps:$4 sm:$0xff]  }
  0x15   :  { %1453 = vmatprep.subr.bf16.mxu1 %v5508_v23  ;;  %1313 = vmatprep.mubr.bf16.mxu0 %v4757_v52  ;;  %v5560_v62 = vld [vmem:[%s8326_s2 + $0x1a8] ss:$16 sps:$4 sm:$0xff]   ;;  %v5563_v63 = vld [vmem:[%s8326_s2 + $0x1c0] ss:$16 sps:$4 sm:$0xff]   ;;  %v5564_v0 = vld [vmem:[%s8326_s2 + $0x1e4] ss:$16 sps:$4 sm:$0xff]  }
  0x16   :  { %1477 = vmatprep.mubr.bf16.mxu1 %v4757_v52  ;;  %v5568_v1 = vld [vmem:[%s8326_s2 + $0x1cc] ss:$16 sps:$4 sm:$0xff]   ;;  %v5566_v3 = vld [vmem:[%s8326_s2 + $0x1c8] ss:$16 sps:$4 sm:$0xff]   ;;  %v5569_v4 = vld [vmem:[%s8326_s2 + $0x1e0] ss:$16 sps:$4 sm:$0xff]  }
  0x17   :  { %1292 = vmatpush1.bf16.msra.mxu0 %v5509_v25  ;;  %v5574_v5 = vld [vmem:[%s8326_s2 + $0x204] ss:$16 sps:$4 sm:$0xff]   ;;  %v5577_v6 = vld [vmem:[%s8326_s2 + $0x1ec] ss:$16 sps:$4 sm:$0xff]   ;;  %v5572_v8 = vld [vmem:[%s8326_s2 + $0x200] ss:$16 sps:$4 sm:$0xff]  }
  0x18   :  { %1454 = vmatpush1.bf16.msra.mxu1 %v5506_v24  ;;  %1293 = vmatprep.subr.bf16.mxu0 %v5510_v26  ;;  %v5575_v9 = vld [vmem:[%s8326_s2 + $0x1e8] ss:$16 sps:$4 sm:$0xff]   ;;  %v5580_v10 = vld [vmem:[%s8326_s2 + $0x224] ss:$16 sps:$4 sm:$0xff]   ;;  %v5583_v11 = vld [vmem:[%s8326_s2 + $0x20c] ss:$16 sps:$4 sm:$0xff]  }
  0x19   :  { %1455 = vmatprep.subr.bf16.mxu1 %v5514_v27  ;;  %v5578_v12 = vld [vmem:[%s8326_s2 + $0x220] ss:$16 sps:$4 sm:$0xff]   ;;  %v5581_v13 = vld [vmem:[%s8326_s2 + $0x208] ss:$16 sps:$4 sm:$0xff]   ;;  %v5586_v14 = vld [vmem:[%s8326_s2 + $0x244] ss:$16 sps:$4 sm:$0xff]  }
  0x1a   :  { %v5589_v15 = vld [vmem:[%s8326_s2 + $0x22c] ss:$16 sps:$4 sm:$0xff]   ;;  %v5584_v16 = vld [vmem:[%s8326_s2 + $0x240] ss:$16 sps:$4 sm:$0xff]   ;;  %v5587_v17 = vld [vmem:[%s8326_s2 + $0x228] ss:$16 sps:$4 sm:$0xff]  }
  0x1b   :  { %1294 = vmatpush1.bf16.msra.mxu0 %v5515_v29  ;;  %v5592_v18 = vld [vmem:[%s8326_s2 + $0x264] ss:$16 sps:$4 sm:$0xff]   ;;  %v5595_v19 = vld [vmem:[%s8326_s2 + $0x24c] ss:$16 sps:$4 sm:$0xff]   ;;  %v5590_v20 = vld [vmem:[%s8326_s2 + $0x260] ss:$16 sps:$4 sm:$0xff]  }
  0x1c   :  { %1456 = vmatpush1.bf16.msra.mxu1 %v5512_v28  ;;  %1295 = vmatprep.subr.bf16.mxu0 %v5516_v30  ;;  %v5593_v21 = vld [vmem:[%s8326_s2 + $0x248] ss:$16 sps:$4 sm:$0xff]   ;;  %v5598_v22 = vld [vmem:[%s8326_s2 + $0x284] ss:$16 sps:$4 sm:$0xff]   ;;  %v5601_v23 = vld [vmem:[%s8326_s2 + $0x26c] ss:$16 sps:$4 sm:$0xff]  }
  0x1d   :  { %1457 = vmatprep.subr.bf16.mxu1 %v5520_v31  ;;  %v5596_v24 = vld [vmem:[%s8326_s2 + $0x280] ss:$16 sps:$4 sm:$0xff]   ;;  %v5599_v25 = vld [vmem:[%s8326_s2 + $0x268] ss:$16 sps:$4 sm:$0xff]   ;;  %v5604_v26 = vld [vmem:[%s8326_s2 + $0x2a4] ss:$16 sps:$4 sm:$0xff]  }
  0x1e   :  { %v5607_v27 = vld [vmem:[%s8326_s2 + $0x28c] ss:$16 sps:$4 sm:$0xff]   ;;  %v5602_v28 = vld [vmem:[%s8326_s2 + $0x2a0] ss:$16 sps:$4 sm:$0xff]   ;;  %v5605_v29 = vld [vmem:[%s8326_s2 + $0x288] ss:$16 sps:$4 sm:$0xff]  }
  0x1f   :  { %1296 = vmatpush1.bf16.msra.mxu0 %v5521_v33  ;;  %v5610_v30 = vld [vmem:[%s8326_s2 + $0x2c4] ss:$16 sps:$4 sm:$0xff]   ;;  %v5613_v31 = vld [vmem:[%s8326_s2 + $0x2ac] ss:$16 sps:$4 sm:$0xff]   ;;  %v5608_v33 = vld [vmem:[%s8326_s2 + $0x2c0] ss:$16 sps:$4 sm:$0xff]  }
  0x20   :  { %1458 = vmatpush1.bf16.msra.mxu1 %v5518_v32  ;;  %1297 = vmatprep.subr.bf16.mxu0 %v5522_v34  ;;  %v6733_v32 = vld [vmem:[%s8324_s0 + $0x8] sm:$0xff]  ;;  %v5640_v52 = vld [vmem:[%s8326_s2 + $0x364] ss:$16 sps:$4 sm:$0xff]  }
  0x21   :  { %1459 = vmatprep.subr.bf16.mxu1 %v5526_v35  ;;  %v5611_v34 = vld [vmem:[%s8326_s2 + $0x2a8] ss:$16 sps:$4 sm:$0xff]   ;;  %v4759_v35 = vcombine.high %v6733_v32, %v6733_v32  ;;  %v5637_v49 = vld [vmem:[%s8326_s2 + $0x32c] ss:$16 sps:$4 sm:$0xff]  }
  0x23   :  { %1298 = vmatpush1.bf16.msra.mxu0 %v5527_v37  ;;  %v5619_v37 = vld [vmem:[%s8326_s2 + $0x2cc] ss:$16 sps:$4 sm:$0xff]  }
  0x24   :  { %1460 = vmatpush1.bf16.msra.mxu1 %v5524_v36  ;;  %1299 = vmatprep.subr.bf16.mxu0 %v5528_v38  ;;  %v5616_v36 = vld [vmem:[%s8326_s2 + $0x2e4] ss:$16 sps:$4 sm:$0xff]   ;;  %v5614_v38 = vld [vmem:[%s8326_s2 + $0x2e0] ss:$16 sps:$4 sm:$0xff]  }
  0x25   :  { %1461 = vmatprep.subr.bf16.mxu1 %v5532_v39  ;;  %v5617_v39 = vld [vmem:[%s8326_s2 + $0x2c8] ss:$16 sps:$4 sm:$0xff]  }
  0x27   :  { %1300 = vmatpush1.bf16.msra.mxu0 %v5533_v41  ;;  %v5625_v41 = vld [vmem:[%s8326_s2 + $0x2ec] ss:$16 sps:$4 sm:$0xff]  }
  0x28   :  { %1462 = vmatpush1.bf16.msra.mxu1 %v5530_v40  ;;  %1301 = vmatprep.subr.bf16.mxu0 %v5534_v42  ;;  %v5622_v40 = vld [vmem:[%s8326_s2 + $0x304] ss:$16 sps:$4 sm:$0xff]   ;;  %v5620_v42 = vld [vmem:[%s8326_s2 + $0x300] ss:$16 sps:$4 sm:$0xff]  }
  0x29   :  { %1463 = vmatprep.subr.bf16.mxu1 %v5538_v43  ;;  %v5623_v43 = vld [vmem:[%s8326_s2 + $0x2e8] ss:$16 sps:$4 sm:$0xff]  }
  0x2b   :  { %1302 = vmatpush1.bf16.msra.mxu0 %v5539_v45  ;;  %v5631_v45 = vld [vmem:[%s8326_s2 + $0x30c] ss:$16 sps:$4 sm:$0xff]  }
  0x2c   :  { %1464 = vmatpush1.bf16.msra.mxu1 %v5536_v44  ;;  %1303 = vmatprep.subr.bf16.mxu0 %v5540_v46  ;;  %v5628_v44 = vld [vmem:[%s8326_s2 + $0x324] ss:$16 sps:$4 sm:$0xff]   ;;  %v5626_v46 = vld [vmem:[%s8326_s2 + $0x320] ss:$16 sps:$4 sm:$0xff]  }
  0x2d   :  { %1465 = vmatprep.subr.bf16.mxu1 %v5544_v47  ;;  %v5629_v47 = vld [vmem:[%s8326_s2 + $0x308] ss:$16 sps:$4 sm:$0xff]  }
  0x2f   :  { %1304 = vmatpush1.bf16.msra.mxu0 %v5545_v50  ;;  %v5632_v50 = vld [vmem:[%s8326_s2 + $0x340] ss:$16 sps:$4 sm:$0xff]  }
  0x30   :  { %1466 = vmatpush1.bf16.msra.mxu1 %v5542_v48  ;;  %1305 = vmatprep.subr.bf16.mxu0 %v5546_v51  ;;  %v5634_v48 = vld [vmem:[%s8326_s2 + $0x344] ss:$16 sps:$4 sm:$0xff]   ;;  %v5635_v51 = vld [vmem:[%s8326_s2 + $0x328] ss:$16 sps:$4 sm:$0xff]  }
  0x31   :  { %1467 = vmatprep.subr.bf16.mxu1 %v5550_v53  ;;  %v5643_v53 = vld [vmem:[%s8326_s2 + $0x34c] ss:$16 sps:$4 sm:$0xff]  }
  0x33   :  { %1306 = vmatpush1.bf16.msra.mxu0 %v5551_v55  ;;  %v5641_v55 = vld [vmem:[%s8326_s2 + $0x348] ss:$16 sps:$4 sm:$0xff]  }
  0x34   :  { %1468 = vmatpush1.bf16.msra.mxu1 %v5548_v54  ;;  %1307 = vmatprep.subr.bf16.mxu0 %v5552_v56  ;;  %v5638_v54 = vld [vmem:[%s8326_s2 + $0x360] ss:$16 sps:$4 sm:$0xff]   ;;  %v5646_v56 = vld [vmem:[%s8326_s2 + $0x384] ss:$16 sps:$4 sm:$0xff]  }
  0x35   :  { %1469 = vmatprep.subr.bf16.mxu1 %v5556_v57  ;;  %v5649_v57 = vld [vmem:[%s8326_s2 + $0x36c] ss:$16 sps:$4 sm:$0xff]  }
  0x37   :  { %1308 = vmatpush1.bf16.msra.mxu0 %v5557_v59  ;;  %v5647_v59 = vld [vmem:[%s8326_s2 + $0x368] ss:$16 sps:$4 sm:$0xff]  }
  0x38   :  { %1470 = vmatpush1.bf16.msra.mxu1 %v5554_v58  ;;  %1309 = vmatprep.subr.bf16.mxu0 %v5558_v60  ;;  %v5644_v58 = vld [vmem:[%s8326_s2 + $0x380] ss:$16 sps:$4 sm:$0xff]   ;;  %v5652_v60 = vld [vmem:[%s8326_s2 + $0x3a4] ss:$16 sps:$4 sm:$0xff]  }
  0x39   :  { %1471 = vmatprep.subr.bf16.mxu1 %v5562_v61  ;;  %v5655_v61 = vld [vmem:[%s8326_s2 + $0x38c] ss:$16 sps:$4 sm:$0xff]  }
  0x3b   :  { %1310 = vmatpush1.bf16.msra.mxu0 %v5563_v63  ;;  %v5653_v63 = vld [vmem:[%s8326_s2 + $0x388] ss:$16 sps:$4 sm:$0xff]  }
  0x3c   :  { %1472 = vmatpush1.bf16.msra.mxu1 %v5560_v62  ;;  %1311 = vmatprep.subr.bf16.mxu0 %v5564_v0  ;;  %v5650_v62 = vld [vmem:[%s8326_s2 + $0x3a0] ss:$16 sps:$4 sm:$0xff]   ;;  %v5658_v0 = vld [vmem:[%s8326_s2 + $0x3c4] ss:$16 sps:$4 sm:$0xff]  }
  0x3d   :  { %1473 = vmatprep.subr.bf16.mxu1 %v5568_v1  ;;  %v5661_v1 = vld [vmem:[%s8326_s2 + $0x3ac] ss:$16 sps:$4 sm:$0xff]  }
  0x3f   :  { %1312 = vmatpush1.bf16.msra.mxu0 %v5569_v4  ;;  %v5659_v4 = vld [vmem:[%s8326_s2 + $0x3a8] ss:$16 sps:$4 sm:$0xff]  }
  0x40   :  { %1474 = vmatpush1.bf16.msra.mxu1 %v5566_v3  ;;  %1322 = vmatprep.subr.bf16.mxu0 %v5574_v5  ;;  %v5656_v3 = vld [vmem:[%s8326_s2 + $0x3c0] ss:$16 sps:$4 sm:$0xff]   ;;  %v5664_v5 = vld [vmem:[%s8326_s2 + $0x3e4] ss:$16 sps:$4 sm:$0xff]  }
  0x41   :  { %1475 = vmatprep.subr.bf16.mxu1 %v5577_v6  ;;  %v5667_v6 = vld [vmem:[%s8326_s2 + $0x3cc] ss:$16 sps:$4 sm:$0xff]  }
  0x42   :  { %1314 = vmatmul.mubr.bf16.vlgmr.msra.gmra.mrb[0].mxu0 %v4756_v7 }
  0x43   :  { %1323 = vmatpush1.bf16.msra.mxu0 %v5572_v8  ;;  %1354 = vmatprep.mubr.bf16.mxu0 %v4759_v35  ;;  %v5665_v8 = vld [vmem:[%s8326_s2 + $0x3c8] ss:$16 sps:$4 sm:$0xff]  }
  0x44   :  { %1476 = vmatpush1.bf16.msra.mxu1 %v5575_v9  ;;  %1324 = vmatprep.subr.bf16.mxu0 %v5580_v10  ;;  %v5672_v9 = vld [vmem:[%s8326_s2 + $0x404] ss:$16 sps:$4 sm:$0xff]   ;;  %v5675_v10 = vld [vmem:[%s8326_s2 + $0x3ec] ss:$16 sps:$4 sm:$0xff]  }
  0x45   :  { %1486 = vmatprep.subr.bf16.mxu1 %v5583_v11  ;;  %v4758_v11 = vcombine.low %v6733_v32, %v6733_v32  ;;  %v5702_v32 = vld [vmem:[%s8326_s2 + $0x4a4] ss:$16 sps:$4 sm:$0xff]  }
  0x47   :  { %1478 = vmatmul.mubr.bf16.vlgmr.msra.gmra.mrb[4].mxu1 %v4756_v7  ;;  %1325 = vmatpush1.bf16.msra.mxu0 %v5578_v12  ;;  %v5662_v7 = vld [vmem:[%s8326_s2 + $0x3e0] ss:$16 sps:$4 sm:$0xff]  }
  0x48   :  { %1487 = vmatpush1.bf16.msra.mxu1 %v5581_v13  ;;  %1326 = vmatprep.subr.bf16.mxu0 %v5586_v14  ;;  %v5670_v12 = vld [vmem:[%s8326_s2 + $0x400] ss:$16 sps:$4 sm:$0xff]   ;;  %v5673_v13 = vld [vmem:[%s8326_s2 + $0x3e8] ss:$16 sps:$4 sm:$0xff]   ;;  %v5678_v14 = vld [vmem:[%s8326_s2 + $0x424] ss:$16 sps:$4 sm:$0xff]  }
  0x49   :  { %1488 = vmatprep.subr.bf16.mxu1 %v5589_v15  ;;  %1518 = vmatprep.mubr.bf16.mxu1 %v4759_v35  ;;  %v5681_v15 = vld [vmem:[%s8326_s2 + $0x40c] ss:$16 sps:$4 sm:$0xff]   ;;  %v5703_v35 = vld [vmem:[%s8326_s2 + $0x488] ss:$16 sps:$4 sm:$0xff]  }
  0x4b   :  { %1327 = vmatpush1.bf16.msra.mxu0 %v5584_v16  ;;  %v6874_v16 = vld [vmem:[%s8324_s0 + $0x10] sm:$0xff] }
  0x4c   :  { %1489 = vmatpush1.bf16.msra.mxu1 %v5587_v17  ;;  %1328 = vmatprep.subr.bf16.mxu0 %v5592_v18  ;;  %v4761_v17 = vcombine.high %v6874_v16, %v6874_v16  ;;  %v5676_v18 = vld [vmem:[%s8326_s2 + $0x420] ss:$16 sps:$4 sm:$0xff]  }
  0x4d   :  { %1490 = vmatprep.subr.bf16.mxu1 %v5595_v19  ;;  %v5679_v19 = vld [vmem:[%s8326_s2 + $0x408] ss:$16 sps:$4 sm:$0xff]  }
  0x4f   :  { %1329 = vmatpush1.bf16.msra.mxu0 %v5590_v20  ;;  %v5684_v20 = vld [vmem:[%s8326_s2 + $0x444] ss:$16 sps:$4 sm:$0xff]  }
  0x50   :  { %1491 = vmatpush1.bf16.msra.mxu1 %v5593_v21  ;;  %1330 = vmatprep.subr.bf16.mxu0 %v5598_v22  ;;  %v5687_v21 = vld [vmem:[%s8326_s2 + $0x42c] ss:$16 sps:$4 sm:$0xff]   ;;  %v5682_v22 = vld [vmem:[%s8326_s2 + $0x440] ss:$16 sps:$4 sm:$0xff]  }
  0x51   :  { %1492 = vmatprep.subr.bf16.mxu1 %v5601_v23  ;;  %v5685_v23 = vld [vmem:[%s8326_s2 + $0x428] ss:$16 sps:$4 sm:$0xff]  }
  0x53   :  { %1331 = vmatpush1.bf16.msra.mxu0 %v5596_v24  ;;  %v5690_v24 = vld [vmem:[%s8326_s2 + $0x464] ss:$16 sps:$4 sm:$0xff]  }
  0x54   :  { %1493 = vmatpush1.bf16.msra.mxu1 %v5599_v25  ;;  %1332 = vmatprep.subr.bf16.mxu0 %v5604_v26  ;;  %v5693_v25 = vld [vmem:[%s8326_s2 + $0x44c] ss:$16 sps:$4 sm:$0xff]   ;;  %v5688_v26 = vld [vmem:[%s8326_s2 + $0x460] ss:$16 sps:$4 sm:$0xff]  }
  0x55   :  { %1494 = vmatprep.subr.bf16.mxu1 %v5607_v27  ;;  %v5691_v27 = vld [vmem:[%s8326_s2 + $0x448] ss:$16 sps:$4 sm:$0xff]  }
  0x57   :  { %1333 = vmatpush1.bf16.msra.mxu0 %v5602_v28  ;;  %v5696_v28 = vld [vmem:[%s8326_s2 + $0x484] ss:$16 sps:$4 sm:$0xff]  }
  0x58   :  { %1495 = vmatpush1.bf16.msra.mxu1 %v5605_v29  ;;  %1334 = vmatprep.subr.bf16.mxu0 %v5610_v30  ;;  %v5699_v29 = vld [vmem:[%s8326_s2 + $0x46c] ss:$16 sps:$4 sm:$0xff]   ;;  %v5694_v30 = vld [vmem:[%s8326_s2 + $0x480] ss:$16 sps:$4 sm:$0xff]  }
  0x59   :  { %1496 = vmatprep.subr.bf16.mxu1 %v5613_v31  ;;  %v5697_v31 = vld [vmem:[%s8326_s2 + $0x468] ss:$16 sps:$4 sm:$0xff]  }
  0x5b   :  { %1335 = vmatpush1.bf16.msra.mxu0 %v5608_v33  ;;  %v5705_v33 = vld [vmem:[%s8326_s2 + $0x48c] ss:$16 sps:$4 sm:$0xff]  }
  0x5c   :  { %1497 = vmatpush1.bf16.msra.mxu1 %v5611_v34  ;;  %1336 = vmatprep.subr.bf16.mxu0 %v5616_v36  ;;  %v5700_v34 = vld [vmem:[%s8326_s2 + $0x4a0] ss:$16 sps:$4 sm:$0xff]   ;;  %v5708_v36 = vld [vmem:[%s8326_s2 + $0x4c4] ss:$16 sps:$4 sm:$0xff]  }
  0x5d   :  { %1498 = vmatprep.subr.bf16.mxu1 %v5619_v37  ;;  %v5711_v37 = vld [vmem:[%s8326_s2 + $0x4ac] ss:$16 sps:$4 sm:$0xff]  }
  0x5f   :  { %1337 = vmatpush1.bf16.msra.mxu0 %v5614_v38  ;;  %v5706_v38 = vld [vmem:[%s8326_s2 + $0x4c0] ss:$16 sps:$4 sm:$0xff]  }
  0x60   :  { %1499 = vmatpush1.bf16.msra.mxu1 %v5617_v39  ;;  %1338 = vmatprep.subr.bf16.mxu0 %v5622_v40  ;;  %v5709_v39 = vld [vmem:[%s8326_s2 + $0x4a8] ss:$16 sps:$4 sm:$0xff]   ;;  %v5714_v40 = vld [vmem:[%s8326_s2 + $0x4e4] ss:$16 sps:$4 sm:$0xff]  }
  0x61   :  { %1500 = vmatprep.subr.bf16.mxu1 %v5625_v41  ;;  %v5717_v41 = vld [vmem:[%s8326_s2 + $0x4cc] ss:$16 sps:$4 sm:$0xff]  }
  0x63   :  { %1339 = vmatpush1.bf16.msra.mxu0 %v5620_v42  ;;  %v5712_v42 = vld [vmem:[%s8326_s2 + $0x4e0] ss:$16 sps:$4 sm:$0xff]  }
  0x64   :  { %1501 = vmatpush1.bf16.msra.mxu1 %v5623_v43  ;;  %1340 = vmatprep.subr.bf16.mxu0 %v5628_v44  ;;  %v5715_v43 = vld [vmem:[%s8326_s2 + $0x4c8] ss:$16 sps:$4 sm:$0xff]   ;;  %v5720_v44 = vld [vmem:[%s8326_s2 + $0x504] ss:$16 sps:$4 sm:$0xff]  }
  0x65   :  { %1502 = vmatprep.subr.bf16.mxu1 %v5631_v45  ;;  %v5723_v45 = vld [vmem:[%s8326_s2 + $0x4ec] ss:$16 sps:$4 sm:$0xff]  }
  0x67   :  { %1341 = vmatpush1.bf16.msra.mxu0 %v5626_v46  ;;  %v5718_v46 = vld [vmem:[%s8326_s2 + $0x500] ss:$16 sps:$4 sm:$0xff]  }
  0x68   :  { %1503 = vmatpush1.bf16.msra.mxu1 %v5629_v47  ;;  %1342 = vmatprep.subr.bf16.mxu0 %v5634_v48  ;;  %v5721_v47 = vld [vmem:[%s8326_s2 + $0x4e8] ss:$16 sps:$4 sm:$0xff]   ;;  %v5726_v48 = vld [vmem:[%s8326_s2 + $0x524] ss:$16 sps:$4 sm:$0xff]  }
  0x69   :  { %1504 = vmatprep.subr.bf16.mxu1 %v5637_v49  ;;  %v5729_v49 = vld [vmem:[%s8326_s2 + $0x50c] ss:$16 sps:$4 sm:$0xff]  }
  0x6b   :  { %1343 = vmatpush1.bf16.msra.mxu0 %v5632_v50  ;;  %v5724_v50 = vld [vmem:[%s8326_s2 + $0x520] ss:$16 sps:$4 sm:$0xff]  }
  0x6c   :  { %1505 = vmatpush1.bf16.msra.mxu1 %v5635_v51  ;;  %1344 = vmatprep.subr.bf16.mxu0 %v5640_v52  ;;  %v5727_v51 = vld [vmem:[%s8326_s2 + $0x508] ss:$16 sps:$4 sm:$0xff]   ;;  %v5732_v52 = vld [vmem:[%s8326_s2 + $0x544] ss:$16 sps:$4 sm:$0xff]  }
  0x6d   :  { %1506 = vmatprep.subr.bf16.mxu1 %v5643_v53  ;;  %v5735_v53 = vld [vmem:[%s8326_s2 + $0x52c] ss:$16 sps:$4 sm:$0xff]  }
  0x6f   :  { %1345 = vmatpush1.bf16.msra.mxu0 %v5638_v54  ;;  %v5730_v54 = vld [vmem:[%s8326_s2 + $0x540] ss:$16 sps:$4 sm:$0xff]  }
  0x70   :  { %1507 = vmatpush1.bf16.msra.mxu1 %v5641_v55  ;;  %1346 = vmatprep.subr.bf16.mxu0 %v5646_v56  ;;  %v5733_v55 = vld [vmem:[%s8326_s2 + $0x528] ss:$16 sps:$4 sm:$0xff]   ;;  %v5738_v56 = vld [vmem:[%s8326_s2 + $0x564] ss:$16 sps:$4 sm:$0xff]  }
  0x71   :  { %1508 = vmatprep.subr.bf16.mxu1 %v5649_v57  ;;  %v5741_v57 = vld [vmem:[%s8326_s2 + $0x54c] ss:$16 sps:$4 sm:$0xff]  }
  0x73   :  { %1347 = vmatpush1.bf16.msra.mxu0 %v5644_v58  ;;  %v5736_v58 = vld [vmem:[%s8326_s2 + $0x560] ss:$16 sps:$4 sm:$0xff]  }
  0x74   :  { %1509 = vmatpush1.bf16.msra.mxu1 %v5647_v59  ;;  %1348 = vmatprep.subr.bf16.mxu0 %v5652_v60  ;;  %v5739_v59 = vld [vmem:[%s8326_s2 + $0x548] ss:$16 sps:$4 sm:$0xff]   ;;  %v5744_v60 = vld [vmem:[%s8326_s2 + $0x584] ss:$16 sps:$4 sm:$0xff]  }
  0x75   :  { %1510 = vmatprep.subr.bf16.mxu1 %v5655_v61  ;;  %v5747_v61 = vld [vmem:[%s8326_s2 + $0x56c] ss:$16 sps:$4 sm:$0xff]  }
  0x77   :  { %1349 = vmatpush1.bf16.msra.mxu0 %v5650_v62  ;;  %v5742_v62 = vld [vmem:[%s8326_s2 + $0x580] ss:$16 sps:$4 sm:$0xff]  }
  0x78   :  { %1511 = vmatpush1.bf16.msra.mxu1 %v5653_v63  ;;  %1350 = vmatprep.subr.bf16.mxu0 %v5658_v0  ;;  %v5745_v63 = vld [vmem:[%s8326_s2 + $0x568] ss:$16 sps:$4 sm:$0xff]   ;;  %v5750_v0 = vld [vmem:[%s8326_s2 + $0x5a4] ss:$16 sps:$4 sm:$0xff]  }
  0x79   :  { %1512 = vmatprep.subr.bf16.mxu1 %v5661_v1  ;;  %v5753_v1 = vld [vmem:[%s8326_s2 + $0x58c] ss:$16 sps:$4 sm:$0xff]  }
  0x7b   :  { %1351 = vmatpush1.bf16.msra.mxu0 %v5656_v3  ;;  %v5748_v3 = vld [vmem:[%s8326_s2 + $0x5a0] ss:$16 sps:$4 sm:$0xff]  }
  0x7c   :  { %1513 = vmatpush1.bf16.msra.mxu1 %v5659_v4  ;;  %1352 = vmatprep.subr.bf16.mxu0 %v5664_v5  ;;  %v5751_v4 = vld [vmem:[%s8326_s2 + $0x588] ss:$16 sps:$4 sm:$0xff]   ;;  %v5756_v5 = vld [vmem:[%s8326_s2 + $0x5c4] ss:$16 sps:$4 sm:$0xff]  }
  0x7d   :  { %1514 = vmatprep.subr.bf16.mxu1 %v5667_v6  ;;  %v5759_v6 = vld [vmem:[%s8326_s2 + $0x5ac] ss:$16 sps:$4 sm:$0xff]  }
  0x7f   :  { %1353 = vmatpush1.bf16.msra.mxu0 %v5662_v7  ;;  %v5754_v7 = vld [vmem:[%s8326_s2 + $0x5c0] ss:$16 sps:$4 sm:$0xff]  }
  0x80   :  { %1515 = vmatpush1.bf16.msra.mxu1 %v5665_v8  ;;  %1363 = vmatprep.subr.bf16.mxu0 %v5672_v9  ;;  %v5757_v8 = vld [vmem:[%s8326_s2 + $0x5a8] ss:$16 sps:$4 sm:$0xff]   ;;  %v5762_v9 = vld [vmem:[%s8326_s2 + $0x5e4] ss:$16 sps:$4 sm:$0xff]  }
  0x81   :  { %1516 = vmatprep.subr.bf16.mxu1 %v5675_v10  ;;  %v5765_v10 = vld [vmem:[%s8326_s2 + $0x5cc] ss:$16 sps:$4 sm:$0xff]  }
  0x82   :  { %1355 = vmatmul.mubr.bf16.vlgmr.msra.gmra.mrb[0].mxu0 %v4758_v11 }
  0x83   :  { %1364 = vmatpush1.bf16.msra.mxu0 %v5670_v12  ;;  %1395 = vmatprep.mubr.bf16.mxu0 %v4761_v17  ;;  %v5763_v12 = vld [vmem:[%s8326_s2 + $0x5c8] ss:$16 sps:$4 sm:$0xff]  }
  0x84   :  { %1517 = vmatpush1.bf16.msra.mxu1 %v5673_v13  ;;  %1365 = vmatprep.subr.bf16.mxu0 %v5678_v14  ;;  %v5770_v13 = vld [vmem:[%s8326_s2 + $0x5ec] ss:$16 sps:$4 sm:$0xff]  }
  0x85   :  { %1527 = vmatprep.subr.bf16.mxu1 %v5681_v15  ;;  %v5776_v14 = vld [vmem:[%s8328_s4 + $0x4] ss:$8 sps:$4 sm:$0xff]   ;;  %v5768_v15 = vld [vmem:[%s8326_s2 + $0x5e8] ss:$16 sps:$4 sm:$0xff]  }
  0x87   :  { %1519 = vmatmul.mubr.bf16.vlgmr.msra.gmra.mrb[4].mxu1 %v4758_v11  ;;  %1366 = vmatpush1.bf16.msra.mxu0 %v5676_v18  ;;  %v5760_v11 = vld [vmem:[%s8326_s2 + $0x5e0] ss:$16 sps:$4 sm:$0xff]   ;;  %v4760_v18 = vcombine.low %v6874_v16, %v6874_v16 }
  0x88   :  { %1528 = vmatpush1.bf16.msra.mxu1 %v5679_v19  ;;  %1367 = vmatprep.subr.bf16.mxu0 %v5684_v20  ;;  %v5773_v19 = vld [vmem:[%s8326_s2 + $0x60c] ss:$16 sps:$4 sm:$0xff]   ;;  %v5777_v16 = vld [vmem:[%s8328_s4 + $0x10] ss:$8 sps:$4 sm:$0xff]  }
  0x89   :  { %1529 = vmatprep.subr.bf16.mxu1 %v5687_v21  ;;  %1559 = vmatprep.mubr.bf16.mxu1 %v4761_v17  ;;  %v5774_v17 = vld [vmem:[%s8328_s4] ss:$8 sps:$4 sm:$0xff]   ;;  %v5779_v20 = vld [vmem:[%s8328_s4 + $0x14] ss:$8 sps:$4 sm:$0xff]  }
  0x8a   :  { %v5771_v21 = vld [vmem:[%s8326_s2 + $0x608] ss:$16 sps:$4 sm:$0xff]  }
  0x8b   :  { %1368 = vmatpush1.bf16.msra.mxu0 %v5682_v22  ;;  %v5782_v22 = vld [vmem:[%s8328_s4 + $0x24] ss:$8 sps:$4 sm:$0xff]  }
  0x8c   :  { %1530 = vmatpush1.bf16.msra.mxu1 %v5685_v23  ;;  %1369 = vmatprep.subr.bf16.mxu0 %v5690_v24  ;;  %v5780_v23 = vld [vmem:[%s8328_s4 + $0x20] ss:$8 sps:$4 sm:$0xff]   ;;  %v5785_v24 = vld [vmem:[%s8328_s4 + $0x34] ss:$8 sps:$4 sm:$0xff]  }
  0x8d   :  { %1531 = vmatprep.subr.bf16.mxu1 %v5693_v25  ;;  %v5783_v25 = vld [vmem:[%s8328_s4 + $0x30] ss:$8 sps:$4 sm:$0xff]  }
  0x8f   :  { %1370 = vmatpush1.bf16.msra.mxu0 %v5688_v26  ;;  %v5788_v26 = vld [vmem:[%s8328_s4 + $0x44] ss:$8 sps:$4 sm:$0xff]  }
  0x90   :  { %1532 = vmatpush1.bf16.msra.mxu1 %v5691_v27  ;;  %1371 = vmatprep.subr.bf16.mxu0 %v5696_v28  ;;  %v5786_v27 = vld [vmem:[%s8328_s4 + $0x40] ss:$8 sps:$4 sm:$0xff]   ;;  %v5791_v28 = vld [vmem:[%s8328_s4 + $0x54] ss:$8 sps:$4 sm:$0xff]  }
  0x91   :  { %1533 = vmatprep.subr.bf16.mxu1 %v5699_v29  ;;  %v6344_v29 = vld [vmem:[%s8324_s0 + $0x18] ss:$0 sps:$4 sm:$0xff]  }
  0x93   :  { %1372 = vmatpush1.bf16.msra.mxu0 %v5694_v30  ;;  %v5789_v30 = vld [vmem:[%s8328_s4 + $0x50] ss:$8 sps:$4 sm:$0xff]  }
  0x94   :  { %1534 = vmatpush1.bf16.msra.mxu1 %v5697_v31  ;;  %1373 = vmatprep.subr.bf16.mxu0 %v5702_v32  ;;  %v5794_v31 = vld [vmem:[%s8328_s4 + $0x64] ss:$8 sps:$4 sm:$0xff]   ;;  %v5792_v32 = vld [vmem:[%s8328_s4 + $0x60] ss:$8 sps:$4 sm:$0xff]  }
  0x95   :  { %1535 = vmatprep.subr.bf16.mxu1 %v5705_v33  ;;  %v5797_v33 = vld [vmem:[%s8328_s4 + $0x74] ss:$8 sps:$4 sm:$0xff]  }
  0x97   :  { %1374 = vmatpush1.bf16.msra.mxu0 %v5700_v34 }
  0x98   :  { %1536 = vmatpush1.bf16.msra.mxu1 %v5703_v35  ;;  %1375 = vmatprep.subr.bf16.mxu0 %v5708_v36  ;;  %v5795_v36 = vld [vmem:[%s8328_s4 + $0x70] ss:$8 sps:$4 sm:$0xff]  }
  0x99   :  { %1537 = vmatprep.subr.bf16.mxu1 %v5711_v37 }
  0x9b   :  { %1376 = vmatpush1.bf16.msra.mxu0 %v5706_v38  ;;  %v5800_v38 = vld [vmem:[%s8328_s4 + $0x84] ss:$8 sps:$4 sm:$0xff]  }
  0x9c   :  { %1538 = vmatpush1.bf16.msra.mxu1 %v5709_v39  ;;  %1377 = vmatprep.subr.bf16.mxu0 %v5714_v40  ;;  %v5798_v40 = vld [vmem:[%s8328_s4 + $0x80] ss:$8 sps:$4 sm:$0xff]  }
  0x9d   :  { %1539 = vmatprep.subr.bf16.mxu1 %v5717_v41  ;;  %v5803_v41 = vld [vmem:[%s8328_s4 + $0x94] ss:$8 sps:$4 sm:$0xff]  }
  0x9f   :  { %1378 = vmatpush1.bf16.msra.mxu0 %v5712_v42  ;;  %v5801_v42 = vld [vmem:[%s8328_s4 + $0x90] ss:$8 sps:$4 sm:$0xff]  }
  0xa0   :  { %1540 = vmatpush1.bf16.msra.mxu1 %v5715_v43  ;;  %1379 = vmatprep.subr.bf16.mxu0 %v5720_v44  ;;  %v5806_v43 = vld [vmem:[%s8328_s4 + $0xa4] ss:$8 sps:$4 sm:$0xff]   ;;  %v5804_v44 = vld [vmem:[%s8328_s4 + $0xa0] ss:$8 sps:$4 sm:$0xff]  }
  0xa1   :  { %1541 = vmatprep.subr.bf16.mxu1 %v5723_v45  ;;  %v5809_v45 = vld [vmem:[%s8328_s4 + $0xb4] ss:$8 sps:$4 sm:$0xff]  }
  0xa3   :  { %1380 = vmatpush1.bf16.msra.mxu0 %v5718_v46  ;;  %v5807_v46 = vld [vmem:[%s8328_s4 + $0xb0] ss:$8 sps:$4 sm:$0xff]  }
  0xa4   :  { %1542 = vmatpush1.bf16.msra.mxu1 %v5721_v47  ;;  %1381 = vmatprep.subr.bf16.mxu0 %v5726_v48  ;;  %v5812_v47 = vld [vmem:[%s8328_s4 + $0xc4] ss:$8 sps:$4 sm:$0xff]   ;;  %v5810_v48 = vld [vmem:[%s8328_s4 + $0xc0] ss:$8 sps:$4 sm:$0xff]  }
  0xa5   :  { %1543 = vmatprep.subr.bf16.mxu1 %v5729_v49  ;;  %v5815_v49 = vld [vmem:[%s8328_s4 + $0xd4] ss:$8 sps:$4 sm:$0xff]  }
  0xa7   :  { %1382 = vmatpush1.bf16.msra.mxu0 %v5724_v50  ;;  %v5813_v50 = vld [vmem:[%s8328_s4 + $0xd0] ss:$8 sps:$4 sm:$0xff]  }
  0xa8   :  { %1544 = vmatpush1.bf16.msra.mxu1 %v5727_v51  ;;  %1383 = vmatprep.subr.bf16.mxu0 %v5732_v52  ;;  %v5818_v51 = vld [vmem:[%s8328_s4 + $0xe4] ss:$8 sps:$4 sm:$0xff]   ;;  %v5816_v52 = vld [vmem:[%s8328_s4 + $0xe0] ss:$8 sps:$4 sm:$0xff]  }
  0xa9   :  { %1545 = vmatprep.subr.bf16.mxu1 %v5735_v53  ;;  %v5821_v53 = vld [vmem:[%s8328_s4 + $0xf4] ss:$8 sps:$4 sm:$0xff]  }
  0xab   :  { %1384 = vmatpush1.bf16.msra.mxu0 %v5730_v54  ;;  %v5819_v54 = vld [vmem:[%s8328_s4 + $0xf0] ss:$8 sps:$4 sm:$0xff]  }
  0xac   :  { %1546 = vmatpush1.bf16.msra.mxu1 %v5733_v55  ;;  %1385 = vmatprep.subr.bf16.mxu0 %v5738_v56 }
  0xad   :  { %1547 = vmatprep.subr.bf16.mxu1 %v5741_v57 }
  0xaf   :  { %1386 = vmatpush1.bf16.msra.mxu0 %v5736_v58 }
  0xb0   :  { %1548 = vmatpush1.bf16.msra.mxu1 %v5739_v59  ;;  %1387 = vmatprep.subr.bf16.mxu0 %v5744_v60 }
  0xb1   :  { %1549 = vmatprep.subr.bf16.mxu1 %v5747_v61 }
  0xb3   :  { %1388 = vmatpush1.bf16.msra.mxu0 %v5742_v62 }
  0xb4   :  { %1550 = vmatpush1.bf16.msra.mxu1 %v5745_v63  ;;  %1389 = vmatprep.subr.bf16.mxu0 %v5750_v0 }
  0xb5   :  { %1551 = vmatprep.subr.bf16.mxu1 %v5753_v1 }
  0xb7   :  { %1390 = vmatpush1.bf16.msra.mxu0 %v5748_v3 }
  0xb8   :  { %1552 = vmatpush1.bf16.msra.mxu1 %v5751_v4  ;;  %1391 = vmatprep.subr.bf16.mxu0 %v5756_v5 }
  0xb9   :  { %1553 = vmatprep.subr.bf16.mxu1 %v5759_v6 }
  0xbb   :  { %1392 = vmatpush1.bf16.msra.mxu0 %v5754_v7 }
  0xbc   :  { %1554 = vmatpush1.bf16.msra.mxu1 %v5757_v8  ;;  %1393 = vmatprep.subr.bf16.mxu0 %v5762_v9 }
  0xbd   :  { %1555 = vmatprep.subr.bf16.mxu1 %v5765_v10 }
  0xbf   :  { %1394 = vmatpush1.bf16.msra.mxu0 %v5760_v11 }
  0xc0   :  { %1556 = vmatpush1.bf16.msra.mxu1 %v5763_v12  ;;  %2013 = vmatprep.subr.bf16.mxu0 %v5776_v14 }
  0xc1   :  { %1557 = vmatprep.subr.bf16.mxu1 %v5770_v13 }
  0xc2   :  { %1396 = vmatmul.mubr.bf16.vlgmr.msra.gmra.mrb[0].mxu0 %v4760_v18 }
  0xc3   :  { %2014 = vmatpush1.bf16.msra.mxu0 %v5774_v17 }
  0xc4   :  { %1558 = vmatpush1.bf16.msra.mxu1 %v5768_v15  ;;  %2015 = vmatprep.subr.bf16.mxu0 %v5779_v20 }
  0xc5   :  { %1568 = vmatprep.subr.bf16.mxu1 %v5773_v19 }
  0xc7   :  { %1560 = vmatmul.mubr.bf16.vlgmr.msra.gmra.mrb[4].mxu1 %v4760_v18  ;;  %2016 = vmatpush1.bf16.msra.mxu0 %v5777_v16 }
  0xc8   :  { %1569 = vmatpush1.bf16.msra.mxu1 %v5771_v21  ;;  %1600 = vmatprep.mubr.bf16.mxu1 %v6369_v2 }
  0xc9   :  { %2017 = vmatprep.subr.bf16.mxu0 %v5782_v22 }
  0xcb   :  { %2018 = vmatpush1.bf16.msra.mxu0 %v5780_v23 }
  0xcc   :  { %2019 = vmatprep.subr.bf16.mxu0 %v5785_v24 }
  0xcf   :  { %2020 = vmatpush1.bf16.msra.mxu0 %v5783_v25 }
  0xd0   :  { %2021 = vmatprep.subr.bf16.mxu0 %v5788_v26 }
  0xd3   :  { %4960 = vmatmul.mubr.msk.bf16.vlgmr.msra.gmra.mrb[4].mxu1 %vm1277_vm0, %v6344_v29  ;;  %2022 = vmatpush1.bf16.msra.mxu0 %v5786_v27 }
  0xd4   :  { %2023 = vmatprep.subr.bf16.mxu0 %v5791_v28 }
  0xd7   :  { %2024 = vmatpush1.bf16.msra.mxu0 %v5789_v30 }
  0xd8   :  { %2025 = vmatprep.subr.bf16.mxu0 %v5794_v31 }
  0xda   :  { %v7116_v34 = vpop.f32.mrb[0].mxu1 }
  0xdb   :  { %v7118_v35 = vpop.f32.mrb[1].mxu1  ;;  %2026 = vmatpush1.bf16.msra.mxu0 %v5792_v32 }
  0xdc   :  { %v1442_v37 = vpop.f32.mrb[2].mxu1  ;;  %2027 = vmatprep.subr.bf16.mxu0 %v5797_v33 }
  0xdd   :  { %v1443_v39 = vpop.f32.mrb[3].mxu1 }
  0xdf   :  { %2028 = vmatpush1.bf16.msra.mxu0 %v5795_v36 }
  0xe0   :  { %2029 = vmatprep.subr.bf16.mxu0 %v5800_v38 }
  0xe3   :  { %2030 = vmatpush1.bf16.msra.mxu0 %v5798_v40 }
  0xe4   :  { %2031 = vmatprep.subr.bf16.mxu0 %v5803_v41 }
  0xe7   :  { %2032 = vmatpush1.bf16.msra.mxu0 %v5801_v42 }
  0xe8   :  { %2033 = vmatprep.subr.bf16.mxu0 %v5806_v43 }
  0xeb   :  { %2034 = vmatpush1.bf16.msra.mxu0 %v5804_v44 }
  0xec   :  { %2035 = vmatprep.subr.bf16.mxu0 %v5809_v45 }
  0xef   :  { %2036 = vmatpush1.bf16.msra.mxu0 %v5807_v46 }
  0xf0   :  { %2037 = vmatprep.subr.bf16.mxu0 %v5812_v47 }
  0xf3   :  { %2038 = vmatpush1.bf16.msra.mxu0 %v5810_v48 }
  0xf4   :  { %2039 = vmatprep.subr.bf16.mxu0 %v5815_v49 }
  0xf7   :  { %2040 = vmatpush1.bf16.msra.mxu0 %v5813_v50 }
  0xf8   :  { %2041 = vmatprep.subr.bf16.mxu0 %v5818_v51 }
  0xfb   :  { %2042 = vmatpush1.bf16.msra.mxu0 %v5816_v52 }
  0xfc   :  { %2043 = vmatprep.subr.bf16.mxu0 %v5821_v53 }
  0xfd   :  { %21 = vsyncpa [#allocation3], 0  ;;  %v5824_v55 = vld [vmem:[%s8328_s4 + $0x104] ss:$8 sps:$4 sm:$0xff]   ;;  %v5874_v60 = vld [vmem:[%s8330_s6 + $0x50] sm:$0xff]   ;;  %v253_v5 = vlaneseq  ;;  %vm2346_vm1 = vcmask 523264  }
  0xfe   :  { %v5870_v56 = vld [vmem:[%s8330_s6 + $0x40] sm:$0xff]   ;;  %v5872_v58 = vld [vmem:[%s8330_s6 + $0x48] sm:$0xff]   ;;  %v5875_v61 = vld [vmem:[%s8330_s6 + $0x10] sm:$0xff]   ;;  %vm4736_vm2 = vcmask 125952  }
  0xff   :  { %2044 = vmatpush1.bf16.msra.mxu0 %v5819_v54  ;;  %v5871_v57 = vld [vmem:[%s8330_s6] sm:$0xff]   ;;  %5354 = vmatprep.subr.bf16.mxu1 %v5870_v56  ;;  %v5873_v59 = vld [vmem:[%s8330_s6 + $0x8] sm:$0xff]   ;;  %v5876_v62 = vld [vmem:[%s8330_s6 + $0x58] sm:$0xff]   ;;  %v7210_v6 = vshrl.u32 %v253_v5, 7 }
 0x100   :  { %2054 = vmatprep.subr.bf16.mxu0 %v5824_v55  ;;  %5355 = vmatpush3.bf16.msra.mxu1 %v5871_v57  ;;  %v5877_v63 = vld [vmem:[%s8330_s6 + $0x18] sm:$0xff]   ;;  %v5878_v0 = vld [vmem:[%s8330_s6 + $0x60] sm:$0xff]   ;;  %v5880_v3 = vld [vmem:[%s8330_s6 + $0x68] sm:$0xff]  }
 0x101   :  { %5356 = vmatprep.subr.bf16.mxu1 %v5872_v58  ;;  %v5879_v1 = vld [vmem:[%s8330_s6 + $0x20] sm:$0xff]   ;;  %v5881_v4 = vld [vmem:[%s8330_s6 + $0x28] sm:$0xff]   ;;  %v7213_v7 = vsub.s32 0, %v7210_v6  ;;  %v7221_v9 = vsub.s32 1, %v7210_v6  ;;  %v5827_v25 = vld [vmem:[%s8328_s4 + $0x114] ss:$8 sps:$4 sm:$0xff]  }
 0x102   :  { %v7218_v8 = vld [vmem:[%s8327_s3] sm:$0xf]  ;;  %v7236_v26 = vsub.s32 3, %v7210_v6  ;;  %v5825_v27 = vld [vmem:[%s8328_s4 + $0x110] ss:$8 sps:$4 sm:$0xff]   ;;  %v7310_v58 = vsub.s32 2, %v7210_v6 }
 0x103   :  { %v256_v10 = vrot.slane %v7218_v8, %v7213_v7  ;;  %v260_v11 = vrot.slane %v7218_v8, %v7221_v9  ;;  %v5822_v23 = vld [vmem:[%s8328_s4 + $0x100] ss:$8 sps:$4 sm:$0xff]   ;;  %v5830_v28 = vld [vmem:[%s8328_s4 + $0x124] ss:$8 sps:$4 sm:$0xff]   ;;  %v5833_v33 = vld [vmem:[%s8328_s4 + $0x134] ss:$8 sps:$4 sm:$0xff]  }
 0x104   :  { %5357 = vmatpush3.bf16.msra.mxu1 %v5873_v59  ;;  %v268_v29 = vrot.slane %v7218_v8, %v7236_v26  ;;  %v5828_v31 = vld [vmem:[%s8328_s4 + $0x120] ss:$8 sps:$4 sm:$0xff]   ;;  %v5831_v38 = vld [vmem:[%s8328_s4 + $0x130] ss:$8 sps:$4 sm:$0xff]   ;;  %v5836_v39 = vld [vmem:[%s8328_s4 + $0x144] ss:$8 sps:$4 sm:$0xff]  }
 0x105   :  { %5358 = vmatprep.subr.bf16.mxu1 %v5874_v60  ;;  %v5834_v41 = vld [vmem:[%s8328_s4 + $0x140] ss:$8 sps:$4 sm:$0xff]   ;;  %v5839_v42 = vld [vmem:[%s8328_s4 + $0x154] ss:$8 sps:$4 sm:$0xff]   ;;  %v5837_v43 = vld [vmem:[%s8328_s4 + $0x150] ss:$8 sps:$4 sm:$0xff]  }
 0x106   :  { %v5842_v44 = vld [vmem:[%s8328_s4 + $0x164] ss:$8 sps:$4 sm:$0xff]   ;;  %v5840_v45 = vld [vmem:[%s8328_s4 + $0x160] ss:$8 sps:$4 sm:$0xff]   ;;  %v5845_v46 = vld [vmem:[%s8328_s4 + $0x174] ss:$8 sps:$4 sm:$0xff]  }
 0x107   :  { %v5843_v47 = vld [vmem:[%s8328_s4 + $0x170] ss:$8 sps:$4 sm:$0xff]   ;;  %v5848_v48 = vld [vmem:[%s8328_s4 + $0x184] ss:$8 sps:$4 sm:$0xff]   ;;  %v5846_v49 = vld [vmem:[%s8328_s4 + $0x180] ss:$8 sps:$4 sm:$0xff]  }
 0x108   :  { %5359 = vmatpush3.bf16.msra.mxu1 %v5875_v61  ;;  %v5851_v50 = vld [vmem:[%s8328_s4 + $0x194] ss:$8 sps:$4 sm:$0xff]   ;;  %v5849_v51 = vld [vmem:[%s8328_s4 + $0x190] ss:$8 sps:$4 sm:$0xff]   ;;  %v5854_v52 = vld [vmem:[%s8328_s4 + $0x1a4] ss:$8 sps:$4 sm:$0xff]   ;;  %v264_v61 = vrot.slane %v7218_v8, %v7310_v58 }
 0x109   :  { %5360 = vmatprep.subr.bf16.mxu1 %v5876_v62  ;;  %v5852_v53 = vld [vmem:[%s8328_s4 + $0x1a0] ss:$8 sps:$4 sm:$0xff]   ;;  %v5857_v54 = vld [vmem:[%s8328_s4 + $0x1b4] ss:$8 sps:$4 sm:$0xff]   ;;  %v5855_v55 = vld [vmem:[%s8328_s4 + $0x1b0] ss:$8 sps:$4 sm:$0xff]  }
 0x10a   :  { %v5860_v56 = vld [vmem:[%s8328_s4 + $0x1c4] ss:$8 sps:$4 sm:$0xff]   ;;  %v5858_v57 = vld [vmem:[%s8328_s4 + $0x1c0] ss:$8 sps:$4 sm:$0xff]   ;;  %v5863_v59 = vld [vmem:[%s8328_s4 + $0x1d4] ss:$8 sps:$4 sm:$0xff]  }
 0x10b   :  { %v5861_v60 = vld [vmem:[%s8328_s4 + $0x1d0] ss:$8 sps:$4 sm:$0xff]   ;;  %v5866_v62 = vld [vmem:[%s8328_s4 + $0x1e4] ss:$8 sps:$4 sm:$0xff]  }
 0x10c   :  { %5361 = vmatpush3.bf16.msra.mxu1 %v5877_v63  ;;  %v5864_v63 = vld [vmem:[%s8328_s4 + $0x1e0] ss:$8 sps:$4 sm:$0xff]   ;;  %v5882_v8 = vld [vmem:[%s8330_s6 + $0x70] sm:$0xff]  }
 0x10d   :  { %5362 = vmatprep.subr.bf16.mxu1 %v5878_v0 }
 0x110   :  { %5363 = vmatpush3.bf16.msra.mxu1 %v5879_v1  ;;  %v5869_v1 = vld [vmem:[%s8328_s4 + $0x1f4] ss:$8 sps:$4 sm:$0xff]  }
 0x111   :  { %5364 = vmatprep.subr.bf16.mxu1 %v5880_v3  ;;  %v5867_v3 = vld [vmem:[%s8328_s4 + $0x1f0] ss:$8 sps:$4 sm:$0xff]  }
 0x114   :  { %5365 = vmatpush3.bf16.msra.mxu1 %v5881_v4 }
 0x115   :  { %5366 = vmatprep.subr.bf16.mxu1 %v5882_v8  ;;  %v5925_v8 = vld [vmem:[%s8334_s10 + $0x120] ss:$16 sps:$4 sm:$0xff]  }
 0x195   :  { %v1397_v12 = vpop.f32.mrb[0].mxu0 }
 0x196   :  { %v5420_v13 = vadd.f32 %v1397_v12, %v256_v10  ;;  %v1399_v14 = vpop.f32.mrb[1].mxu0  ;;  %v5883_v10 = vld [vmem:[%s8330_s6 + $0x30] sm:$0xff]   ;;  %v5885_v12 = vld [vmem:[%s8330_s6 + $0x38] sm:$0xff]  }
 0x197   :  { %v5422_v15 = vadd.f32 %v1399_v14, %v260_v11  ;;  %v1401_v17 = vpop.f32.mrb[2].mxu0  ;;  %5367 = vmatpush3.bf16.msra.mxu1 %v5883_v10  ;;  %v5884_v11 = vld [vmem:[%s8330_s6 + $0x78] sm:$0xff]   ;;  %v5930_v10 = vld [vmem:[%s8334_s10 + $0x144] ss:$16 sps:$4 sm:$0xff]  }
 0x198   :  { %v5421_v18 = vadd.f32 %v5420_v13, %v7116_v34  ;;  %v1402_v19 = vpop.f32.mrb[3].mxu0  ;;  %5368 = vmatprep.subr.bf16.mxu1 %v5884_v11  ;;  %v1681_v13 = vld [vmem:[%s8329_s5] sm:$0x3] }
 0x199   :  { %v5423_v20 = vadd.f32 %v5422_v15, %v7118_v35  ;;  %v1686_v14 = vrot.slane %v1681_v13, %v7213_v7  ;;  %v1690_v15 = vrot.slane %v1681_v13, %v7221_v9  ;;  %v5928_v11 = vld [vmem:[%s8334_s10 + $0x140] ss:$16 sps:$4 sm:$0xff]  }
 0x19a   :  { %v1609_v21 = vmax.f32 %v5421_v18, 0.0  ;;  %v5931_v13 = vld [vmem:[%s8334_s10 + $0x160] ss:$16 sps:$4 sm:$0xff]  }
 0x19b   :  { %v1610_v16 = vmax.f32 %v5423_v20, 0.0  ;;  %5369 = vmatpush3.bf16.msra.mxu1 %v5885_v12  ;;  %v5933_v12 = vld [vmem:[%s8334_s10 + $0x164] ss:$16 sps:$4 sm:$0xff]  }
 0x19c   :  { %v1613_v24 = vpack.c.bf16 %v1609_v21, %v1609_v21 }
 0x19d   :  { %v1614_v22 = vpack.c.bf16 %v1610_v16, %v1610_v16 }
 0x19f   :  { %2045 = vmatprep.mubr.bf16.mxu0 %v1614_v22 }
 0x1a0   :  { %2046 = vmatmul.mubr.bf16.vlgmr.msra.gmra.mrb[4].mxu0 %v1613_v24 }
 0x1a1   :  { %2055 = vmatpush1.bf16.msra.mxu0 %v5822_v23 }
 0x1a2   :  { %2056 = vmatprep.subr.bf16.mxu0 %v5827_v25 }
 0x1a5   :  { %2057 = vmatpush1.bf16.msra.mxu0 %v5825_v27  ;;  %v5886_v27 = vld [vmem:[%s8332_s8] ss:$8 sps:$4 sm:$0xff]  }
 0x1a6   :  { %v1602_v30 = vpop.f32.mrb[4].mxu1  ;;  %2058 = vmatprep.subr.bf16.mxu0 %v5830_v28  ;;  %v5888_v28 = vld [vmem:[%s8332_s8 + $0x4] ss:$8 sps:$4 sm:$0xff]  }
 0x1a7   :  { %v1604_v32 = vpop.f32.mrb[5].mxu1  ;;  %v5424_v0 = vadd.f32 %v1602_v30, %v264_v61  ;;  %2350 = vmatprep.subr.bf16.mxu1 %v5888_v28  ;;  %v5889_v30 = vld [vmem:[%s8332_s8 + $0x10] ss:$8 sps:$4 sm:$0xff]  }
 0x1a8   :  { %v5425_v34 = vadd.f32 %v1604_v32, %v268_v29  ;;  %v1606_v35 = vpop.f32.mrb[6].mxu1  ;;  %v5891_v29 = vld [vmem:[%s8332_s8 + $0x14] ss:$8 sps:$4 sm:$0xff]   ;;  %v5913_v61 = vld [vmem:[%s8334_s10 + $0xa0] ss:$16 sps:$4 sm:$0xff]  }
 0x1a9   :  { %v1607_v36 = vpop.f32.mrb[7].mxu1  ;;  %2059 = vmatpush1.bf16.msra.mxu0 %v5828_v31  ;;  %v1611_v4 = vmax.f32 %v5424_v0, 0.0  ;;  %v5892_v31 = vld [vmem:[%s8332_s8 + $0x20] ss:$8 sps:$4 sm:$0xff]   ;;  %v5921_v0 = vld [vmem:[%s8334_s10 + $0xe4] ss:$16 sps:$4 sm:$0xff]  }
 0x1aa   :  { %v1612_v37 = vmax.f32 %v5425_v34, 0.0  ;;  %2060 = vmatprep.subr.bf16.mxu0 %v5833_v33  ;;  %v5025_v33 = vld [vmem:[%s8331_s7] ss:$0 sm:$0xff]  ;;  %v6008_v28 = vld [vmem:[%s8336_s12 + $0x74] ss:$28 sps:$4 sm:$0xff]  }
 0x1ab   :  { %v1615_v5 = vpack.c.bf16 %v1611_v4, %v1611_v4  ;;  %v5922_v4 = vld [vmem:[%s8334_s10 + $0x100] ss:$16 sps:$4 sm:$0xff]  }
 0x1ac   :  { %v1616_v40 = vpack.c.bf16 %v1612_v37, %v1612_v37 }
 0x1ad   :  { %2061 = vmatpush1.bf16.msra.mxu0 %v5831_v38 }
 0x1ae   :  { %2086 = vmatprep.mubr.bf16.mxu0 %v1616_v40  ;;  %2062 = vmatprep.subr.bf16.mxu0 %v5836_v39 }
 0x1b1   :  { %2063 = vmatpush1.bf16.msra.mxu0 %v5834_v41  ;;  %v5897_v41 = vld [vmem:[%s8332_s8 + $0x34] ss:$8 sps:$4 sm:$0xff]  }
 0x1b2   :  { %2064 = vmatprep.subr.bf16.mxu0 %v5839_v42  ;;  %v5895_v42 = vld [vmem:[%s8332_s8 + $0x30] ss:$8 sps:$4 sm:$0xff]  }
 0x1b5   :  { %2065 = vmatpush1.bf16.msra.mxu0 %v5837_v43  ;;  %v5900_v43 = vld [vmem:[%s8334_s10 + $0x4] ss:$16 sps:$4 sm:$0xff]  }
 0x1b6   :  { %2066 = vmatprep.subr.bf16.mxu0 %v5842_v44 }
 0x1b9   :  { %2067 = vmatpush1.bf16.msra.mxu0 %v5840_v45  ;;  %v2275_v45 = vld [vmem:[%s8325_s1] sm:$0xff] }
 0x1ba   :  { %2068 = vmatprep.subr.bf16.mxu0 %v5845_v46 }
 0x1bd   :  { %2069 = vmatpush1.bf16.msra.mxu0 %v5843_v47 }
 0x1be   :  { %2070 = vmatprep.subr.bf16.mxu0 %v5848_v48 }
 0x1c1   :  { %2071 = vmatpush1.bf16.msra.mxu0 %v5846_v49  ;;  %v5898_v49 = vld [vmem:[%s8334_s10] ss:$16 sps:$4 sm:$0xff]  }
 0x1c2   :  { %2072 = vmatprep.subr.bf16.mxu0 %v5851_v50 }
 0x1c5   :  { %2073 = vmatpush1.bf16.msra.mxu0 %v5849_v51  ;;  %v5903_v51 = vld [vmem:[%s8334_s10 + $0x24] ss:$16 sps:$4 sm:$0xff]  }
 0x1c6   :  { %2074 = vmatprep.subr.bf16.mxu0 %v5854_v52  ;;  %v5901_v52 = vld [vmem:[%s8334_s10 + $0x20] ss:$16 sps:$4 sm:$0xff]  }
 0x1c9   :  { %2075 = vmatpush1.bf16.msra.mxu0 %v5852_v53  ;;  %v5906_v53 = vld [vmem:[%s8334_s10 + $0x44] ss:$16 sps:$4 sm:$0xff]  }
 0x1ca   :  { %2076 = vmatprep.subr.bf16.mxu0 %v5857_v54  ;;  %v5904_v54 = vld [vmem:[%s8334_s10 + $0x40] ss:$16 sps:$4 sm:$0xff]  }
 0x1cd   :  { %2077 = vmatpush1.bf16.msra.mxu0 %v5855_v55  ;;  %v5909_v55 = vld [vmem:[%s8334_s10 + $0x64] ss:$16 sps:$4 sm:$0xff]  }
 0x1ce   :  { %2078 = vmatprep.subr.bf16.mxu0 %v5860_v56  ;;  %v5907_v56 = vld [vmem:[%s8334_s10 + $0x60] ss:$16 sps:$4 sm:$0xff]  }
 0x1d1   :  { %2079 = vmatpush1.bf16.msra.mxu0 %v5858_v57  ;;  %v5912_v57 = vld [vmem:[%s8334_s10 + $0x84] ss:$16 sps:$4 sm:$0xff]  }
 0x1d2   :  { %2080 = vmatprep.subr.bf16.mxu0 %v5863_v59  ;;  %v5910_v59 = vld [vmem:[%s8334_s10 + $0x80] ss:$16 sps:$4 sm:$0xff]  }
 0x1d5   :  { %2081 = vmatpush1.bf16.msra.mxu0 %v5861_v60  ;;  %v5915_v60 = vld [vmem:[%s8334_s10 + $0xa4] ss:$16 sps:$4 sm:$0xff]  }
 0x1d6   :  { %2082 = vmatprep.subr.bf16.mxu0 %v5866_v62  ;;  %v5918_v62 = vld [vmem:[%s8334_s10 + $0xc4] ss:$16 sps:$4 sm:$0xff]  }
 0x1d9   :  { %2083 = vmatpush1.bf16.msra.mxu0 %v5864_v63  ;;  %v5916_v63 = vld [vmem:[%s8334_s10 + $0xc0] ss:$16 sps:$4 sm:$0xff]  }
 0x1da   :  { %2084 = vmatprep.subr.bf16.mxu0 %v5869_v1  ;;  %v5919_v1 = vld [vmem:[%s8334_s10 + $0xe0] ss:$16 sps:$4 sm:$0xff]  }
 0x1dd   :  { %2085 = vmatpush1.bf16.msra.mxu0 %v5867_v3  ;;  %v5924_v3 = vld [vmem:[%s8334_s10 + $0x104] ss:$16 sps:$4 sm:$0xff]  }
 0x1e0   :  { %2087 = vmatmul.mubr.bf16.vlgmr.msra.gmra.mrb[4].mxu0 %v1615_v5  ;;  %v5927_v5 = vld [vmem:[%s8334_s10 + $0x124] ss:$16 sps:$4 sm:$0xff]  }
 0x2b3   :  { %v2088_v17 = vpop.f32.mrb[4].mxu0 }
 0x2b4   :  { %v5426_v18 = vadd.f32 %v2088_v17, %v1686_v14  ;;  %v2090_v19 = vpop.f32.mrb[5].mxu0  ;;  %v5936_v14 = vld [vmem:[%s8334_s10 + $0x184] ss:$16 sps:$4 sm:$0xff]  }
 0x2b5   :  { %v5427_v20 = vadd.f32 %v2090_v19, %v1690_v15  ;;  %v2092_v21 = vpop.f32.mrb[6].mxu0  ;;  %v5934_v15 = vld [vmem:[%s8334_s10 + $0x180] ss:$16 sps:$4 sm:$0xff]   ;;  %v5939_v17 = vld [vmem:[%s8334_s10 + $0x1a4] ss:$16 sps:$4 sm:$0xff]  }
 0x2b6   :  { %v2095_v16 = vmax.f32 %v5426_v18, 0.0  ;;  %v2093_v22 = vpop.f32.mrb[7].mxu0  ;;  %v5937_v18 = vld [vmem:[%s8334_s10 + $0x1a0] ss:$16 sps:$4 sm:$0xff]   ;;  %v5942_v19 = vld [vmem:[%s8334_s10 + $0x1c4] ss:$16 sps:$4 sm:$0xff]  }
 0x2b7   :  { %v2096_v23 = vmax.f32 %v5427_v20, 0.0  ;;  %v5940_v20 = vld [vmem:[%s8334_s10 + $0x1c0] ss:$16 sps:$4 sm:$0xff]   ;;  %v5945_v21 = vld [vmem:[%s8334_s10 + $0x1e4] ss:$16 sps:$4 sm:$0xff]  }
 0x2b8   :  { %v2097_v25 = vpack.c.bf16 %v2095_v16, %v2095_v16  ;;  %v5943_v16 = vld [vmem:[%s8334_s10 + $0x1e0] ss:$16 sps:$4 sm:$0xff]   ;;  %v5948_v22 = vld [vmem:[%s8334_s10 + $0xc] ss:$16 sps:$4 sm:$0xff]  }
 0x2b9   :  { %v2098_v24 = vpack.c.bf16 %v2096_v23, %v2096_v23  ;;  %v5994_v23 = vld [vmem:[%s8336_s12] ss:$28 sps:$4 sm:$0xff]  }
 0x2bb   :  { %2266 = vmatprep.mubr.bf16.mxu1 %v2098_v24  ;;  %v5996_v24 = vld [vmem:[%s8336_s12 + $0x4] ss:$28 sps:$4 sm:$0xff]  }
 0x2bc   :  { %2267 = vmatmul.mubr.bf16.vlgmr.msra.gmra.mrb[8].mxu1 %v2097_v25  ;;  %v6002_v25 = vld [vmem:[%s8336_s12 + $0x3c] ss:$28 sps:$4 sm:$0xff]   ;;  %4336 = vmatprep.subr.bf16.mxu0 %v5996_v24 }
 0x2bd   :  { %2382 = vmatprep.mubr.bf16.mxu1 %v6369_v2  ;;  %2351 = vmatpush1.bf16.msra.mxu1 %v5886_v27  ;;  %v5894_v2 = vld [vmem:[%s8332_s8 + $0x24] ss:$8 sps:$4 sm:$0xff]   ;;  %v6000_v27 = vld [vmem:[%s8336_s12 + $0x38] ss:$28 sps:$4 sm:$0xff]  }
 0x2be   :  { %2352 = vmatprep.subr.bf16.mxu1 %v5891_v29  ;;  %4337 = vmatpush1.bf16.msra.mxu0 %v5994_v23  ;;  %v6006_v29 = vld [vmem:[%s8336_s12 + $0x70] ss:$28 sps:$4 sm:$0xff]   ;;  %v5973_v23 = vld [vmem:[%s8334_s10 + $0x128] ss:$16 sps:$4 sm:$0xff]  }
 0x2bf   :  { %4338 = vmatprep.subr.bf16.mxu0 %v6002_v25  ;;  %v5978_v24 = vld [vmem:[%s8334_s10 + $0x14c] ss:$16 sps:$4 sm:$0xff]   ;;  %v5976_v25 = vld [vmem:[%s8334_s10 + $0x148] ss:$16 sps:$4 sm:$0xff]  }
 0x2c1   :  { %2353 = vmatpush1.bf16.msra.mxu1 %v5889_v30  ;;  %v6014_v30 = vld [vmem:[%s8336_s12 + $0xac] ss:$28 sps:$4 sm:$0xff]  }
 0x2c2   :  { %2354 = vmatprep.subr.bf16.mxu1 %v5894_v2  ;;  %4339 = vmatpush1.bf16.msra.mxu0 %v6000_v27  ;;  %v6012_v2 = vld [vmem:[%s8336_s12 + $0xa8] ss:$28 sps:$4 sm:$0xff]   ;;  %v5981_v27 = vld [vmem:[%s8334_s10 + $0x16c] ss:$16 sps:$4 sm:$0xff]  }
 0x2c3   :  { %4340 = vmatprep.subr.bf16.mxu0 %v6008_v28  ;;  %v5979_v28 = vld [vmem:[%s8334_s10 + $0x168] ss:$16 sps:$4 sm:$0xff]  }
 0x2c5   :  { %2355 = vmatpush1.bf16.msra.mxu1 %v5892_v31  ;;  %v6020_v31 = vld [vmem:[%s8336_s12 + $0xe4] ss:$28 sps:$4 sm:$0xff]  }
 0x2c6   :  { %2356 = vmatprep.subr.bf16.mxu1 %v5897_v41  ;;  %4341 = vmatpush1.bf16.msra.mxu0 %v6006_v29  ;;  %v6050_v41 = vld [vmem:[%s8336_s12 + $0x1fc] ss:$28 sps:$4 sm:$0xff]  }
 0x2c7   :  { %4342 = vmatprep.subr.bf16.mxu0 %v6014_v30  ;;  %v5984_v29 = vld [vmem:[%s8334_s10 + $0x18c] ss:$16 sps:$4 sm:$0xff]   ;;  %v5982_v30 = vld [vmem:[%s8334_s10 + $0x188] ss:$16 sps:$4 sm:$0xff]  }
 0x2c9   :  { %2357 = vmatpush1.bf16.msra.mxu1 %v5895_v42  ;;  %v6048_v42 = vld [vmem:[%s8336_s12 + $0x1f8] ss:$28 sps:$4 sm:$0xff]  }
 0x2ca   :  { %2801 = vmatprep.subr.bf16.mxu1 %v5900_v43  ;;  %4343 = vmatpush1.bf16.msra.mxu0 %v6012_v2  ;;  %v6056_v43 = vld [vmem:[%s8336_s12 + $0x234] ss:$28 sps:$4 sm:$0xff]   ;;  %v5987_v2 = vld [vmem:[%s8334_s10 + $0x1ac] ss:$16 sps:$4 sm:$0xff]  }
 0x2cb   :  { %4344 = vmatprep.subr.bf16.mxu0 %v6020_v31  ;;  %v5985_v31 = vld [vmem:[%s8334_s10 + $0x1a8] ss:$16 sps:$4 sm:$0xff]  }
 0x38f   :  { %v5370_v32 = vpop.f32.mrb[8].mxu1 }
 0x390   :  { %v5371_v34 = vpop.f32.mrb[9].mxu1 }
 0x391   :  { %v5372_v35 = vadd.f32 %v5371_v34, %v5370_v32  ;;  %v5373_v36 = vpop.f32.mrb[10].mxu1  ;;  %v6018_v32 = vld [vmem:[%s8336_s12 + $0xe0] ss:$28 sps:$4 sm:$0xff]   ;;  %v6024_v34 = vld [vmem:[%s8336_s12 + $0x118] ss:$28 sps:$4 sm:$0xff]  }
 0x392   :  { %v5374_v37 = vpop.f32.mrb[11].mxu1  ;;  %4345 = vmatpush1.bf16.msra.mxu0 %v6018_v32  ;;  %v6030_v36 = vld [vmem:[%s8336_s12 + $0x150] ss:$28 sps:$4 sm:$0xff]  }
 0x393   :  { %v2269_v38 = vadd.f32 %v5372_v35, %v5025_v33  ;;  %v6026_v33 = vld [vmem:[%s8336_s12 + $0x11c] ss:$28 sps:$4 sm:$0xff]   ;;  %v6032_v35 = vld [vmem:[%s8336_s12 + $0x154] ss:$28 sps:$4 sm:$0xff]   ;;  %v6038_v37 = vld [vmem:[%s8336_s12 + $0x18c] ss:$28 sps:$4 sm:$0xff]  }
 0x394   :  { %4346 = vmatprep.subr.bf16.mxu0 %v6026_v33  ;;  %v5990_v32 = vld [vmem:[%s8334_s10 + $0x1cc] ss:$16 sps:$4 sm:$0xff]   ;;  %v5988_v33 = vld [vmem:[%s8334_s10 + $0x1c8] ss:$16 sps:$4 sm:$0xff]  }
 0x395   :  { %2274 = vst [vmem:[%s8338_s14] sm:$0xff] %v2269_v38  ;;  %v2276_v39 = vmul.f32 0.5, %v2269_v38  ;;  %s6370_s14 = smov 64  }
 0x396   :  { %4347 = vmatpush1.bf16.msra.mxu0 %v6024_v34  ;;  %v5993_v34 = vld [vmem:[%s8334_s10 + $0x1ec] ss:$16 sps:$4 sm:$0xff]  }
 0x397   :  { %v2277_v40 = vmul.f32 1.442695, %v2276_v39  ;;  %4348 = vmatprep.subr.bf16.mxu0 %v6032_v35  ;;  %v6044_v39 = vld [vmem:[%s8336_s12 + $0x1c4] ss:$28 sps:$4 sm:$0xff]   ;;  %v5991_v35 = vld [vmem:[%s8334_s10 + $0x1e8] ss:$16 sps:$4 sm:$0xff]  }
 0x399   :  { %6314 = vpow2.f32 %v2277_v40  ;;  %v6042_v40 = vld [vmem:[%s8336_s12 + $0x1c0] ss:$28 sps:$4 sm:$0xff]  }
 0x39a   :  { %4349 = vmatpush1.bf16.msra.mxu0 %v6030_v36  ;;  %v5999_v36 = vld [vmem:[%s8336_s12 + $0xc] ss:$28 sps:$4 sm:$0xff]  }
 0x39b   :  { %4350 = vmatprep.subr.bf16.mxu0 %v6038_v37  ;;  %v5997_v37 = vld [vmem:[%s8336_s12 + $0x8] ss:$28 sps:$4 sm:$0xff]  }
 0x3a3   :  { %v6315_v44 = vpop.eup %6314 }
 0x3a4   :  { %2280 = vrot.lane.b32.xlu0 %v6315_v44, %s6370_s14  ;;  %v6054_v44 = vld [vmem:[%s8336_s12 + $0x230] ss:$28 sps:$4 sm:$0xff]  }
 0x416   :  { %v2281_v46 = vpop.permute.xlu0 %2280 }
 0x417   :  { %v2283_v47 = vmul.f32 %v2281_v46, %v2275_v45  ;;  %v6062_v45 = vld [vmem:[%s8336_s12 + $0x26c] ss:$28 sps:$4 sm:$0xff]  }
 0x418   :  { %v6060_v46 = vld [vmem:[%s8336_s12 + $0x268] ss:$28 sps:$4 sm:$0xff]  }
 0x419   :  { %v2284_v48 = vadd.f32 %v2283_v47, %v2269_v38  ;;  %v6036_v38 = vld [vmem:[%s8336_s12 + $0x188] ss:$28 sps:$4 sm:$0xff]  }
 0x41a   :  { %4351 = vmatpush1.bf16.msra.mxu0 %v6036_v38  ;;  %v6068_v47 = vld [vmem:[%s8336_s12 + $0x2a4] ss:$28 sps:$4 sm:$0xff]  }
 0x41b   :  { %v2285_v50 = vpack.c.bf16 %v2284_v48, %v2284_v48  ;;  %4352 = vmatprep.subr.bf16.mxu0 %v6044_v39  ;;  %v6066_v48 = vld [vmem:[%s8336_s12 + $0x2a0] ss:$28 sps:$4 sm:$0xff]  }
 0x41c   :  { %v6005_v38 = vld [vmem:[%s8336_s12 + $0x44] ss:$28 sps:$4 sm:$0xff]  }
 0x41d   :  { %5050 = vmatmul.mubr.msk.bf16.vlgmr.msra.gmra.mrb[12].mxu1 %vm2346_vm1, %v2285_v50  ;;  %v6074_v50 = vld [vmem:[%s8336_s12 + $0x2dc] ss:$28 sps:$4 sm:$0xff]  }
 0x41e   :  { %2802 = vmatpush1.bf16.msra.mxu1 %v5898_v49  ;;  %4353 = vmatpush1.bf16.msra.mxu0 %v6042_v40  ;;  %v2294_v49 = vld [vmem:[%s8333_s9] sm:$0x3]  ;;  %v6011_v40 = vld [vmem:[%s8336_s12 + $0x7c] ss:$28 sps:$4 sm:$0xff]  }
 0x41f   :  { %2803 = vmatprep.subr.bf16.mxu1 %v5903_v51  ;;  %4354 = vmatprep.subr.bf16.mxu0 %v6050_v41  ;;  %v6072_v51 = vld [vmem:[%s8336_s12 + $0x2d8] ss:$28 sps:$4 sm:$0xff]   ;;  %v6003_v39 = vld [vmem:[%s8336_s12 + $0x40] ss:$28 sps:$4 sm:$0xff]  }
 0x420   :  { %v6009_v41 = vld [vmem:[%s8336_s12 + $0x78] ss:$28 sps:$4 sm:$0xff]  }
 0x422   :  { %2804 = vmatpush1.bf16.msra.mxu1 %v5901_v52  ;;  %4355 = vmatpush1.bf16.msra.mxu0 %v6048_v42  ;;  %v2299_v52 = vrot.slane %v2294_v49, %v7213_v7  ;;  %v6017_v42 = vld [vmem:[%s8336_s12 + $0xb4] ss:$28 sps:$4 sm:$0xff]  }
 0x423   :  { %2805 = vmatprep.subr.bf16.mxu1 %v5906_v53  ;;  %4356 = vmatprep.subr.bf16.mxu0 %v6056_v43  ;;  %v2303_v53 = vrot.slane %v2294_v49, %v7221_v9  ;;  %v6015_v43 = vld [vmem:[%s8336_s12 + $0xb0] ss:$28 sps:$4 sm:$0xff]  }
 0x424   :  { %v6080_v49 = vld [vmem:[%s8336_s12 + $0x314] ss:$28 sps:$4 sm:$0xff]  }
 0x426   :  { %2806 = vmatpush1.bf16.msra.mxu1 %v5904_v54  ;;  %4357 = vmatpush1.bf16.msra.mxu0 %v6054_v44  ;;  %v6023_v44 = vld [vmem:[%s8336_s12 + $0xec] ss:$28 sps:$4 sm:$0xff]  }
 0x427   :  { %2807 = vmatprep.subr.bf16.mxu1 %v5909_v55  ;;  %4358 = vmatprep.subr.bf16.mxu0 %v6062_v45  ;;  %v6021_v45 = vld [vmem:[%s8336_s12 + $0xe8] ss:$28 sps:$4 sm:$0xff]  }
 0x42a   :  { %2808 = vmatpush1.bf16.msra.mxu1 %v5907_v56  ;;  %4359 = vmatpush1.bf16.msra.mxu0 %v6060_v46  ;;  %v6029_v46 = vld [vmem:[%s8336_s12 + $0x124] ss:$28 sps:$4 sm:$0xff]  }
 0x42b   :  { %2809 = vmatprep.subr.bf16.mxu1 %v5912_v57  ;;  %4360 = vmatprep.subr.bf16.mxu0 %v6068_v47  ;;  %v6027_v47 = vld [vmem:[%s8336_s12 + $0x120] ss:$28 sps:$4 sm:$0xff]  }
 0x42e   :  { %2810 = vmatpush1.bf16.msra.mxu1 %v5910_v59  ;;  %4361 = vmatpush1.bf16.msra.mxu0 %v6066_v48  ;;  %v6035_v48 = vld [vmem:[%s8336_s12 + $0x15c] ss:$28 sps:$4 sm:$0xff]  }
 0x42f   :  { %2811 = vmatprep.subr.bf16.mxu1 %v5915_v60  ;;  %4362 = vmatprep.subr.bf16.mxu0 %v6074_v50  ;;  %v6078_v50 = vld [vmem:[%s8336_s12 + $0x310] ss:$28 sps:$4 sm:$0xff]  }
 0x432   :  { %2812 = vmatpush1.bf16.msra.mxu1 %v5913_v61  ;;  %4363 = vmatpush1.bf16.msra.mxu0 %v6072_v51  ;;  %v6033_v51 = vld [vmem:[%s8336_s12 + $0x158] ss:$28 sps:$4 sm:$0xff]  }
 0x433   :  { %2813 = vmatprep.subr.bf16.mxu1 %v5918_v62  ;;  %4364 = vmatprep.subr.bf16.mxu0 %v6080_v49  ;;  %v6123_v49 = vld [vmem:[%s8336_s12 + $0x4a0] ss:$28 sps:$4 sm:$0xff]  }
 0x436   :  { %2814 = vmatpush1.bf16.msra.mxu1 %v5916_v63  ;;  %4365 = vmatpush1.bf16.msra.mxu0 %v6078_v50  ;;  %v6128_v50 = vld [vmem:[%s8336_s12 + $0x4d4] ss:$28 sps:$4 sm:$0xff]  }
 0x437   :  { %2815 = vmatprep.subr.bf16.mxu1 %v5921_v0  ;;  %v5946_v0 = vld [vmem:[%s8334_s10 + $0x8] ss:$16 sps:$4 sm:$0xff]  }
 0x43a   :  { %2816 = vmatpush1.bf16.msra.mxu1 %v5919_v1 }
 0x43b   :  { %2817 = vmatprep.subr.bf16.mxu1 %v5924_v3  ;;  %v5951_v3 = vld [vmem:[%s8334_s10 + $0x2c] ss:$16 sps:$4 sm:$0xff]  }
 0x43e   :  { %2818 = vmatpush1.bf16.msra.mxu1 %v5922_v4  ;;  %v5949_v4 = vld [vmem:[%s8334_s10 + $0x28] ss:$16 sps:$4 sm:$0xff]  }
 0x43f   :  { %2819 = vmatprep.subr.bf16.mxu1 %v5927_v5  ;;  %v5954_v5 = vld [vmem:[%s8334_s10 + $0x4c] ss:$16 sps:$4 sm:$0xff]  }
 0x442   :  { %2820 = vmatpush1.bf16.msra.mxu1 %v5925_v8  ;;  %v5952_v8 = vld [vmem:[%s8334_s10 + $0x48] ss:$16 sps:$4 sm:$0xff]  }
 0x443   :  { %2821 = vmatprep.subr.bf16.mxu1 %v5930_v10  ;;  %v5957_v10 = vld [vmem:[%s8334_s10 + $0x6c] ss:$16 sps:$4 sm:$0xff]  }
 0x446   :  { %2822 = vmatpush1.bf16.msra.mxu1 %v5928_v11  ;;  %v5955_v11 = vld [vmem:[%s8334_s10 + $0x68] ss:$16 sps:$4 sm:$0xff]  }
 0x447   :  { %2823 = vmatprep.subr.bf16.mxu1 %v5933_v12  ;;  %v5960_v12 = vld [vmem:[%s8334_s10 + $0x8c] ss:$16 sps:$4 sm:$0xff]  }
 0x44a   :  { %2824 = vmatpush1.bf16.msra.mxu1 %v5931_v13  ;;  %v5958_v13 = vld [vmem:[%s8334_s10 + $0x88] ss:$16 sps:$4 sm:$0xff]  }
 0x44b   :  { %2825 = vmatprep.subr.bf16.mxu1 %v5936_v14  ;;  %v5963_v14 = vld [vmem:[%s8334_s10 + $0xac] ss:$16 sps:$4 sm:$0xff]  }
 0x44e   :  { %2826 = vmatpush1.bf16.msra.mxu1 %v5934_v15  ;;  %v5961_v15 = vld [vmem:[%s8334_s10 + $0xa8] ss:$16 sps:$4 sm:$0xff]  }
 0x44f   :  { %2827 = vmatprep.subr.bf16.mxu1 %v5939_v17  ;;  %v5966_v17 = vld [vmem:[%s8334_s10 + $0xcc] ss:$16 sps:$4 sm:$0xff]  }
 0x452   :  { %2828 = vmatpush1.bf16.msra.mxu1 %v5937_v18  ;;  %v5964_v18 = vld [vmem:[%s8334_s10 + $0xc8] ss:$16 sps:$4 sm:$0xff]  }
 0x453   :  { %2829 = vmatprep.subr.bf16.mxu1 %v5942_v19  ;;  %v5969_v19 = vld [vmem:[%s8334_s10 + $0xec] ss:$16 sps:$4 sm:$0xff]  }
 0x456   :  { %2830 = vmatpush1.bf16.msra.mxu1 %v5940_v20  ;;  %v5967_v20 = vld [vmem:[%s8334_s10 + $0xe8] ss:$16 sps:$4 sm:$0xff]  }
 0x457   :  { %2831 = vmatprep.subr.bf16.mxu1 %v5945_v21  ;;  %v5972_v21 = vld [vmem:[%s8334_s10 + $0x10c] ss:$16 sps:$4 sm:$0xff]  }
 0x45a   :  { %2832 = vmatpush1.bf16.msra.mxu1 %v5943_v16  ;;  %v5970_v16 = vld [vmem:[%s8334_s10 + $0x108] ss:$16 sps:$4 sm:$0xff]  }
 0x45b   :  { %2842 = vmatprep.subr.bf16.mxu1 %v5948_v22  ;;  %v5975_v22 = vld [vmem:[%s8334_s10 + $0x12c] ss:$16 sps:$4 sm:$0xff]  }
 0x4f0   :  { %v2384_v54 = vpop.f32.mrb[12].mxu1 }
 0x4f1   :  { %v2385_v55 = vadd.f32 %v2384_v54, %v2299_v52  ;;  %v2386_v56 = vpop.f32.mrb[13].mxu1  ;;  %v6041_v52 = vld [vmem:[%s8336_s12 + $0x194] ss:$28 sps:$4 sm:$0xff]   ;;  %v6084_v54 = vld [vmem:[%s8336_s12 + $0x348] ss:$28 sps:$4 sm:$0xff]  }
 0x4f2   :  { %v2387_v57 = vadd.f32 %v2386_v56, %v2303_v53  ;;  %v2388_v59 = vpop.f32.mrb[14].mxu1  ;;  %v6086_v53 = vld [vmem:[%s8336_s12 + $0x34c] ss:$28 sps:$4 sm:$0xff]  }
 0x4f3   :  { %v2391_v60 = vmax.f32 %v2385_v55, 0.0  ;;  %v2389_v61 = vpop.f32.mrb[15].mxu1  ;;  %4366 = vmatprep.subr.bf16.mxu0 %v6086_v53  ;;  %v6039_v55 = vld [vmem:[%s8336_s12 + $0x190] ss:$28 sps:$4 sm:$0xff]   ;;  %v6045_v59 = vld [vmem:[%s8336_s12 + $0x1c8] ss:$28 sps:$4 sm:$0xff]  }
 0x4f4   :  { %v2392_v62 = vmax.f32 %v2387_v57, 0.0  ;;  %4367 = vmatpush1.bf16.msra.mxu0 %v6084_v54  ;;  %v6047_v56 = vld [vmem:[%s8336_s12 + $0x1cc] ss:$28 sps:$4 sm:$0xff]   ;;  %v6092_v57 = vld [vmem:[%s8336_s12 + $0x384] ss:$28 sps:$4 sm:$0xff]  }
 0x4f5   :  { %v7574_v1 = vpack.c.bf16 %v2391_v60, %v2391_v60  ;;  %4377 = vmatprep.subr.bf16.mxu0 %v6092_v57  ;;  %v6053_v60 = vld [vmem:[%s8336_s12 + $0x204] ss:$28 sps:$4 sm:$0xff]   ;;  %v6129_v53 = vld [vmem:[%s8336_s12 + $0x4d8] ss:$28 sps:$4 sm:$0xff]   ;;  %v6134_v54 = vld [vmem:[%s8336_s12 + $0x50c] ss:$28 sps:$4 sm:$0xff]  }
 0x4f6   :  { %v2394_v63 = vpack.c.bf16 %v2392_v62, %v2392_v62  ;;  %v6051_v61 = vld [vmem:[%s8336_s12 + $0x200] ss:$28 sps:$4 sm:$0xff]   ;;  %v6135_v57 = vld [vmem:[%s8336_s12 + $0x510] ss:$28 sps:$4 sm:$0xff]  }
 0x4f7   :  { %v6059_v62 = vld [vmem:[%s8336_s12 + $0x23c] ss:$28 sps:$4 sm:$0xff]  }
 0x4f8   :  { %2833 = vmatprep.mubr.bf16.mxu1 %v2394_v63 }
 0x4f9   :  { %2834 = vmatmul.mubr.bf16.vlgmr.msra.gmra.mrb[16].mxu1 %v7574_v1 }
 0x4fa   :  { %2843 = vmatpush1.bf16.msra.mxu1 %v5946_v0  ;;  %2874 = vmatprep.mubr.bf16.mxu1 %v2394_v63  ;;  %v6057_v63 = vld [vmem:[%s8336_s12 + $0x238] ss:$28 sps:$4 sm:$0xff]  }
 0x4fb   :  { %2844 = vmatprep.subr.bf16.mxu1 %v5951_v3  ;;  %v6065_v0 = vld [vmem:[%s8336_s12 + $0x274] ss:$28 sps:$4 sm:$0xff]   ;;  %v6071_v3 = vld [vmem:[%s8336_s12 + $0x2ac] ss:$28 sps:$4 sm:$0xff]  }
 0x4fe   :  { %2845 = vmatpush1.bf16.msra.mxu1 %v5949_v4  ;;  %v6069_v4 = vld [vmem:[%s8336_s12 + $0x2a8] ss:$28 sps:$4 sm:$0xff]  }
 0x4ff   :  { %2846 = vmatprep.subr.bf16.mxu1 %v5954_v5  ;;  %v6077_v5 = vld [vmem:[%s8336_s12 + $0x2e4] ss:$28 sps:$4 sm:$0xff]  }
 0x502   :  { %2847 = vmatpush1.bf16.msra.mxu1 %v5952_v8  ;;  %v6075_v8 = vld [vmem:[%s8336_s12 + $0x2e0] ss:$28 sps:$4 sm:$0xff]  }
 0x503   :  { %2848 = vmatprep.subr.bf16.mxu1 %v5957_v10  ;;  %v6083_v10 = vld [vmem:[%s8336_s12 + $0x31c] ss:$28 sps:$4 sm:$0xff]  }
 0x506   :  { %2849 = vmatpush1.bf16.msra.mxu1 %v5955_v11  ;;  %v6081_v11 = vld [vmem:[%s8336_s12 + $0x318] ss:$28 sps:$4 sm:$0xff]  }
 0x507   :  { %2850 = vmatprep.subr.bf16.mxu1 %v5960_v12  ;;  %v6089_v12 = vld [vmem:[%s8336_s12 + $0x354] ss:$28 sps:$4 sm:$0xff]  }
 0x50a   :  { %2851 = vmatpush1.bf16.msra.mxu1 %v5958_v13  ;;  %v6087_v13 = vld [vmem:[%s8336_s12 + $0x350] ss:$28 sps:$4 sm:$0xff]  }
 0x50b   :  { %2852 = vmatprep.subr.bf16.mxu1 %v5963_v14  ;;  %v6095_v14 = vld [vmem:[%s8336_s12 + $0x38c] ss:$28 sps:$4 sm:$0xff]  }
 0x50e   :  { %2853 = vmatpush1.bf16.msra.mxu1 %v5961_v15  ;;  %v7785_v15 = vld [vmem:[%s8335_s11] sm:$0xf] }
 0x50f   :  { %2854 = vmatprep.subr.bf16.mxu1 %v5966_v17  ;;  %v2464_v17 = vrot.slane %v7785_v15, %v7213_v7 }
 0x512   :  { %2855 = vmatpush1.bf16.msra.mxu1 %v5964_v18  ;;  %v2468_v18 = vrot.slane %v7785_v15, %v7221_v9 }
 0x513   :  { %2856 = vmatprep.subr.bf16.mxu1 %v5969_v19 }
 0x516   :  { %2857 = vmatpush1.bf16.msra.mxu1 %v5967_v20 }
 0x517   :  { %2858 = vmatprep.subr.bf16.mxu1 %v5972_v21 }
 0x51a   :  { %2859 = vmatpush1.bf16.msra.mxu1 %v5970_v16 }
 0x51b   :  { %2860 = vmatprep.subr.bf16.mxu1 %v5975_v22 }
 0x51e   :  { %2861 = vmatpush1.bf16.msra.mxu1 %v5973_v23 }
 0x51f   :  { %2862 = vmatprep.subr.bf16.mxu1 %v5978_v24 }
 0x522   :  { %2863 = vmatpush1.bf16.msra.mxu1 %v5976_v25 }
 0x523   :  { %2864 = vmatprep.subr.bf16.mxu1 %v5981_v27 }
 0x526   :  { %2865 = vmatpush1.bf16.msra.mxu1 %v5979_v28  ;;  %v6090_v28 = vld [vmem:[%s8336_s12 + $0x380] ss:$28 sps:$4 sm:$0xff]  }
 0x527   :  { %2866 = vmatprep.subr.bf16.mxu1 %v5984_v29  ;;  %v6093_v29 = vld [vmem:[%s8336_s12 + $0x388] ss:$28 sps:$4 sm:$0xff]  }
 0x52a   :  { %2867 = vmatpush1.bf16.msra.mxu1 %v5982_v30 }
 0x52b   :  { %2868 = vmatprep.subr.bf16.mxu1 %v5987_v2  ;;  %v6098_v2 = vld [vmem:[%s8336_s12 + $0x3bc] ss:$28 sps:$4 sm:$0xff]  }
 0x52e   :  { %2869 = vmatpush1.bf16.msra.mxu1 %v5985_v31  ;;  %v6101_v31 = vld [vmem:[%s8336_s12 + $0x3c4] ss:$28 sps:$4 sm:$0xff]  }
 0x52f   :  { %2870 = vmatprep.subr.bf16.mxu1 %v5990_v32  ;;  %v6096_v32 = vld [vmem:[%s8336_s12 + $0x3b8] ss:$28 sps:$4 sm:$0xff]  }
 0x532   :  { %2871 = vmatpush1.bf16.msra.mxu1 %v5988_v33  ;;  %v6099_v33 = vld [vmem:[%s8336_s12 + $0x3c0] ss:$28 sps:$4 sm:$0xff]  }
 0x533   :  { %2872 = vmatprep.subr.bf16.mxu1 %v5993_v34  ;;  %v6104_v34 = vld [vmem:[%s8336_s12 + $0x3f4] ss:$28 sps:$4 sm:$0xff]  }
 0x536   :  { %2873 = vmatpush1.bf16.msra.mxu1 %v5991_v35  ;;  %v6107_v35 = vld [vmem:[%s8336_s12 + $0x3fc] ss:$28 sps:$4 sm:$0xff]  }
 0x537   :  { %4418 = vmatprep.subr.bf16.mxu1 %v5999_v36  ;;  %v6102_v36 = vld [vmem:[%s8336_s12 + $0x3f0] ss:$28 sps:$4 sm:$0xff]  }
 0x539   :  { %2875 = vmatmul.mubr.bf16.vlgmr.msra.gmra.mrb[20].mxu1 %v7574_v1  ;;  %v6063_v1 = vld [vmem:[%s8336_s12 + $0x270] ss:$28 sps:$4 sm:$0xff]  }
 0x53a   :  { %4419 = vmatpush1.bf16.msra.mxu1 %v5997_v37  ;;  %v6105_v37 = vld [vmem:[%s8336_s12 + $0x3f8] ss:$28 sps:$4 sm:$0xff]  }
 0x53b   :  { %4420 = vmatprep.subr.bf16.mxu1 %v6005_v38  ;;  %v6110_v38 = vld [vmem:[%s8336_s12 + $0x42c] ss:$28 sps:$4 sm:$0xff]  }
 0x53e   :  { %4421 = vmatpush1.bf16.msra.mxu1 %v6003_v39  ;;  %v6113_v39 = vld [vmem:[%s8336_s12 + $0x434] ss:$28 sps:$4 sm:$0xff]  }
 0x53f   :  { %4422 = vmatprep.subr.bf16.mxu1 %v6011_v40  ;;  %v6108_v40 = vld [vmem:[%s8336_s12 + $0x428] ss:$28 sps:$4 sm:$0xff]  }
 0x542   :  { %4423 = vmatpush1.bf16.msra.mxu1 %v6009_v41  ;;  %v6111_v41 = vld [vmem:[%s8336_s12 + $0x430] ss:$28 sps:$4 sm:$0xff]  }
 0x543   :  { %4424 = vmatprep.subr.bf16.mxu1 %v6017_v42  ;;  %v6116_v42 = vld [vmem:[%s8336_s12 + $0x464] ss:$28 sps:$4 sm:$0xff]  }
 0x546   :  { %4425 = vmatpush1.bf16.msra.mxu1 %v6015_v43  ;;  %v6119_v43 = vld [vmem:[%s8336_s12 + $0x46c] ss:$28 sps:$4 sm:$0xff]  }
 0x547   :  { %4426 = vmatprep.subr.bf16.mxu1 %v6023_v44  ;;  %v6114_v44 = vld [vmem:[%s8336_s12 + $0x460] ss:$28 sps:$4 sm:$0xff]  }
 0x54a   :  { %4427 = vmatpush1.bf16.msra.mxu1 %v6021_v45  ;;  %v6117_v45 = vld [vmem:[%s8336_s12 + $0x468] ss:$28 sps:$4 sm:$0xff]  }
 0x54b   :  { %4428 = vmatprep.subr.bf16.mxu1 %v6029_v46  ;;  %v6122_v46 = vld [vmem:[%s8336_s12 + $0x49c] ss:$28 sps:$4 sm:$0xff]  }
 0x54e   :  { %4429 = vmatpush1.bf16.msra.mxu1 %v6027_v47  ;;  %v6125_v47 = vld [vmem:[%s8336_s12 + $0x4a4] ss:$28 sps:$4 sm:$0xff]  }
 0x54f   :  { %4430 = vmatprep.subr.bf16.mxu1 %v6035_v48  ;;  %v6120_v48 = vld [vmem:[%s8336_s12 + $0x498] ss:$28 sps:$4 sm:$0xff]  }
 0x552   :  { %4431 = vmatpush1.bf16.msra.mxu1 %v6033_v51  ;;  %v6131_v51 = vld [vmem:[%s8336_s12 + $0x4dc] ss:$28 sps:$4 sm:$0xff]  }
 0x553   :  { %4432 = vmatprep.subr.bf16.mxu1 %v6041_v52  ;;  %v6126_v52 = vld [vmem:[%s8336_s12 + $0x4d0] ss:$28 sps:$4 sm:$0xff]  }
 0x556   :  { %4433 = vmatpush1.bf16.msra.mxu1 %v6039_v55  ;;  %v6137_v55 = vld [vmem:[%s8336_s12 + $0x514] ss:$28 sps:$4 sm:$0xff]  }
 0x557   :  { %4434 = vmatprep.subr.bf16.mxu1 %v6047_v56  ;;  %v6132_v56 = vld [vmem:[%s8336_s12 + $0x508] ss:$28 sps:$4 sm:$0xff]  }
 0x55a   :  { %4435 = vmatpush1.bf16.msra.mxu1 %v6045_v59  ;;  %v6140_v59 = vld [vmem:[%s8336_s12 + $0x544] ss:$28 sps:$4 sm:$0xff]  }
 0x55b   :  { %4436 = vmatprep.subr.bf16.mxu1 %v6053_v60  ;;  %v6143_v60 = vld [vmem:[%s8336_s12 + $0x54c] ss:$28 sps:$4 sm:$0xff]  }
 0x55e   :  { %4437 = vmatpush1.bf16.msra.mxu1 %v6051_v61  ;;  %v6138_v61 = vld [vmem:[%s8336_s12 + $0x540] ss:$28 sps:$4 sm:$0xff]  }
 0x55f   :  { %4438 = vmatprep.subr.bf16.mxu1 %v6059_v62  ;;  %v6141_v62 = vld [vmem:[%s8336_s12 + $0x548] ss:$28 sps:$4 sm:$0xff]  }
 0x562   :  { %4439 = vmatpush1.bf16.msra.mxu1 %v6057_v63  ;;  %v6146_v63 = vld [vmem:[%s8336_s12 + $0x57c] ss:$28 sps:$4 sm:$0xff]  }
 0x563   :  { %4440 = vmatprep.subr.bf16.mxu1 %v6065_v0  ;;  %v6149_v0 = vld [vmem:[%s8336_s12 + $0x584] ss:$28 sps:$4 sm:$0xff]  }
 0x566   :  { %4441 = vmatpush1.bf16.msra.mxu1 %v6063_v1  ;;  %v6144_v1 = vld [vmem:[%s8336_s12 + $0x578] ss:$28 sps:$4 sm:$0xff]  }
 0x567   :  { %4442 = vmatprep.subr.bf16.mxu1 %v6071_v3  ;;  %v6147_v3 = vld [vmem:[%s8336_s12 + $0x580] ss:$28 sps:$4 sm:$0xff]  }
 0x56a   :  { %4443 = vmatpush1.bf16.msra.mxu1 %v6069_v4  ;;  %v6152_v4 = vld [vmem:[%s8336_s12 + $0x5b4] ss:$28 sps:$4 sm:$0xff]  }
 0x56b   :  { %4444 = vmatprep.subr.bf16.mxu1 %v6077_v5  ;;  %v6155_v5 = vld [vmem:[%s8336_s12 + $0x5bc] ss:$28 sps:$4 sm:$0xff]  }
 0x56e   :  { %4445 = vmatpush1.bf16.msra.mxu1 %v6075_v8  ;;  %v6150_v8 = vld [vmem:[%s8336_s12 + $0x5b0] ss:$28 sps:$4 sm:$0xff]  }
 0x56f   :  { %4446 = vmatprep.subr.bf16.mxu1 %v6083_v10  ;;  %v6153_v10 = vld [vmem:[%s8336_s12 + $0x5b8] ss:$28 sps:$4 sm:$0xff]  }
 0x572   :  { %4447 = vmatpush1.bf16.msra.mxu1 %v6081_v11  ;;  %v6158_v11 = vld [vmem:[%s8336_s12 + $0x5ec] ss:$28 sps:$4 sm:$0xff]  }
 0x573   :  { %4448 = vmatprep.subr.bf16.mxu1 %v6089_v12  ;;  %v6161_v12 = vld [vmem:[%s8336_s12 + $0x5f4] ss:$28 sps:$4 sm:$0xff]  }
 0x576   :  { %4449 = vmatpush1.bf16.msra.mxu1 %v6087_v13  ;;  %v6156_v13 = vld [vmem:[%s8336_s12 + $0x5e8] ss:$28 sps:$4 sm:$0xff]  }
 0x577   :  { %4459 = vmatprep.subr.bf16.mxu1 %v6095_v14  ;;  %v6159_v14 = vld [vmem:[%s8336_s12 + $0x5f0] ss:$28 sps:$4 sm:$0xff]  }
 0x5cc   :  { %v2835_v19 = vpop.f32.mrb[16].mxu1 }
 0x5cd   :  { %v2836_v20 = vadd.f32 %v2835_v19, %v2464_v17  ;;  %v2837_v21 = vpop.f32.mrb[17].mxu1  ;;  %v6164_v17 = vld [vmem:[%s8336_s12 + $0x624] ss:$28 sps:$4 sm:$0xff]  }
 0x5ce   :  { %v2838_v16 = vadd.f32 %v2837_v21, %v2468_v18  ;;  %v2839_v22 = vpop.f32.mrb[18].mxu1  ;;  %v6167_v18 = vld [vmem:[%s8336_s12 + $0x62c] ss:$28 sps:$4 sm:$0xff]   ;;  %v6162_v19 = vld [vmem:[%s8336_s12 + $0x620] ss:$28 sps:$4 sm:$0xff]  }
 0x5cf   :  { %v2883_v23 = vmax.f32 %v2836_v20, 0.0  ;;  %v2840_v24 = vpop.f32.mrb[19].mxu1  ;;  %v6165_v20 = vld [vmem:[%s8336_s12 + $0x628] ss:$28 sps:$4 sm:$0xff]   ;;  %v6170_v21 = vld [vmem:[%s8336_s12 + $0x65c] ss:$28 sps:$4 sm:$0xff]  }
 0x5d0   :  { %v2884_v25 = vmax.f32 %v2838_v16, 0.0  ;;  %v6173_v16 = vld [vmem:[%s8336_s12 + $0x664] ss:$28 sps:$4 sm:$0xff]   ;;  %v6168_v22 = vld [vmem:[%s8336_s12 + $0x658] ss:$28 sps:$4 sm:$0xff]  }
 0x5d1   :  { %v7799_v30 = vpack.c.bf16 %v2883_v23, %v2883_v23  ;;  %v6171_v23 = vld [vmem:[%s8336_s12 + $0x660] ss:$28 sps:$4 sm:$0xff]   ;;  %v6176_v24 = vld [vmem:[%s8336_s12 + $0x694] ss:$28 sps:$4 sm:$0xff]  }
 0x5d2   :  { %v7791_v27 = vpack.c.bf16 %v2884_v25, %v2884_v25  ;;  %v6179_v25 = vld [vmem:[%s8336_s12 + $0x69c] ss:$28 sps:$4 sm:$0xff]  }
 0x5d4   :  { %4368 = vmatprep.mubr.bf16.mxu0 %v7791_v27  ;;  %4450 = vmatprep.mubr.bf16.mxu1 %v7791_v27 }
 0x5d5   :  { %4369 = vmatmul.mubr.bf16.vlgmr.msra.gmra.mrb[8].mxu0 %v7799_v30  ;;  %4451 = vmatmul.mubr.bf16.vlgmr.msra.gmra.mrb[24].mxu1 %v7799_v30 }
 0x5d6   :  { %4378 = vmatpush1.bf16.msra.mxu0 %v6090_v28  ;;  %4460 = vmatpush1.bf16.msra.mxu1 %v6093_v29  ;;  %v2472_v28 = vrot.slane %v7785_v15, %v7310_v58  ;;  %v2476_v29 = vrot.slane %v7785_v15, %v7236_v26 }
 0x5d7   :  { %4379 = vmatprep.subr.bf16.mxu0 %v6098_v2  ;;  %4461 = vmatprep.subr.bf16.mxu1 %v6101_v31  ;;  %v6174_v2 = vld [vmem:[%s8336_s12 + $0x690] ss:$28 sps:$4 sm:$0xff]   ;;  %v6177_v31 = vld [vmem:[%s8336_s12 + $0x698] ss:$28 sps:$4 sm:$0xff]  }
 0x5da   :  { %4380 = vmatpush1.bf16.msra.mxu0 %v6096_v32  ;;  %4462 = vmatpush1.bf16.msra.mxu1 %v6099_v33  ;;  %v6182_v32 = vld [vmem:[%s8336_s12 + $0x6cc] ss:$28 sps:$4 sm:$0xff]   ;;  %v6185_v33 = vld [vmem:[%s8336_s12 + $0x6d4] ss:$28 sps:$4 sm:$0xff]  }
 0x5db   :  { %4381 = vmatprep.subr.bf16.mxu0 %v6104_v34  ;;  %4463 = vmatprep.subr.bf16.mxu1 %v6107_v35 }
 0x5de   :  { %4382 = vmatpush1.bf16.msra.mxu0 %v6102_v36  ;;  %4464 = vmatpush1.bf16.msra.mxu1 %v6105_v37 }
 0x5df   :  { %4383 = vmatprep.subr.bf16.mxu0 %v6110_v38  ;;  %4465 = vmatprep.subr.bf16.mxu1 %v6113_v39  ;;  %v6180_v38 = vld [vmem:[%s8336_s12 + $0x6c8] ss:$28 sps:$4 sm:$0xff]   ;;  %v6183_v39 = vld [vmem:[%s8336_s12 + $0x6d0] ss:$28 sps:$4 sm:$0xff]  }
 0x5e2   :  { %4384 = vmatpush1.bf16.msra.mxu0 %v6108_v40  ;;  %4466 = vmatpush1.bf16.msra.mxu1 %v6111_v41 }
 0x5e3   :  { %4385 = vmatprep.subr.bf16.mxu0 %v6116_v42  ;;  %4467 = vmatprep.subr.bf16.mxu1 %v6119_v43  ;;  %v6188_v42 = vld [vmem:[%s8336_s12 + $0x14] ss:$28 sps:$4 sm:$0xff]  }
 0x5e4   :  { %v6189_v43 = vld [vmem:[%s8336_s12 + $0x1d8] ss:$28 sps:$4 sm:$0xff]  }
 0x5e6   :  { %4386 = vmatpush1.bf16.msra.mxu0 %v6114_v44  ;;  %4468 = vmatpush1.bf16.msra.mxu1 %v6117_v45 }
 0x5e7   :  { %4387 = vmatprep.subr.bf16.mxu0 %v6122_v46  ;;  %4469 = vmatprep.subr.bf16.mxu1 %v6125_v47  ;;  %v6186_v46 = vld [vmem:[%s8336_s12 + $0x10] ss:$28 sps:$4 sm:$0xff]  }
 0x5ea   :  { %4388 = vmatpush1.bf16.msra.mxu0 %v6120_v48  ;;  %4470 = vmatpush1.bf16.msra.mxu1 %v6123_v49  ;;  %v6190_v48 = vld [vmem:[%s8336_s12 + $0x18] ss:$28 sps:$4 sm:$0xff]   ;;  %v6193_v49 = vld [vmem:[%s8336_s12 + $0x4c] ss:$28 sps:$4 sm:$0xff]  }
 0x5eb   :  { %4389 = vmatprep.subr.bf16.mxu0 %v6128_v50  ;;  %4471 = vmatprep.subr.bf16.mxu1 %v6131_v51  ;;  %v6194_v50 = vld [vmem:[%s8336_s12 + $0x210] ss:$28 sps:$4 sm:$0xff]   ;;  %v6191_v51 = vld [vmem:[%s8336_s12 + $0x48] ss:$28 sps:$4 sm:$0xff]  }
 0x5ee   :  { %4390 = vmatpush1.bf16.msra.mxu0 %v6126_v52  ;;  %4472 = vmatpush1.bf16.msra.mxu1 %v6129_v53  ;;  %v6195_v52 = vld [vmem:[%s8336_s12 + $0x50] ss:$28 sps:$4 sm:$0xff]   ;;  %v6198_v53 = vld [vmem:[%s8336_s12 + $0x84] ss:$28 sps:$4 sm:$0xff]  }
 0x5ef   :  { %4391 = vmatprep.subr.bf16.mxu0 %v6134_v54  ;;  %4473 = vmatprep.subr.bf16.mxu1 %v6137_v55  ;;  %v6199_v54 = vld [vmem:[%s8336_s12 + $0x248] ss:$28 sps:$4 sm:$0xff]   ;;  %v6196_v55 = vld [vmem:[%s8336_s12 + $0x80] ss:$28 sps:$4 sm:$0xff]  }
 0x5f2   :  { %4392 = vmatpush1.bf16.msra.mxu0 %v6132_v56  ;;  %4474 = vmatpush1.bf16.msra.mxu1 %v6135_v57  ;;  %v6203_v56 = vld [vmem:[%s8336_s12 + $0xbc] ss:$28 sps:$4 sm:$0xff]  }
 0x5f3   :  { %4393 = vmatprep.subr.bf16.mxu0 %v6140_v59  ;;  %4475 = vmatprep.subr.bf16.mxu1 %v6143_v60  ;;  %v6204_v57 = vld [vmem:[%s8336_s12 + $0x280] ss:$28 sps:$4 sm:$0xff]   ;;  %v6201_v59 = vld [vmem:[%s8336_s12 + $0xb8] ss:$28 sps:$4 sm:$0xff]  }
 0x5f4   :  { %v6205_v60 = vld [vmem:[%s8336_s12 + $0xc0] ss:$28 sps:$4 sm:$0xff]  }
 0x5f6   :  { %4394 = vmatpush1.bf16.msra.mxu0 %v6138_v61  ;;  %4476 = vmatpush1.bf16.msra.mxu1 %v6141_v62  ;;  %v6208_v61 = vld [vmem:[%s8336_s12 + $0xf4] ss:$28 sps:$4 sm:$0xff]  }
 0x5f7   :  { %4395 = vmatprep.subr.bf16.mxu0 %v6146_v63  ;;  %4477 = vmatprep.subr.bf16.mxu1 %v6149_v0  ;;  %v6209_v62 = vld [vmem:[%s8336_s12 + $0x2b8] ss:$28 sps:$4 sm:$0xff]   ;;  %v6206_v63 = vld [vmem:[%s8336_s12 + $0xf0] ss:$28 sps:$4 sm:$0xff]  }
 0x5f8   :  { %v6210_v0 = vld [vmem:[%s8336_s12 + $0xf8] ss:$28 sps:$4 sm:$0xff]  }
 0x5fa   :  { %4396 = vmatpush1.bf16.msra.mxu0 %v6144_v1  ;;  %4478 = vmatpush1.bf16.msra.mxu1 %v6147_v3  ;;  %v6213_v1 = vld [vmem:[%s8336_s12 + $0x12c] ss:$28 sps:$4 sm:$0xff]  }
 0x5fb   :  { %4397 = vmatprep.subr.bf16.mxu0 %v6152_v4  ;;  %4479 = vmatprep.subr.bf16.mxu1 %v6155_v5  ;;  %v6214_v3 = vld [vmem:[%s8336_s12 + $0x2f0] ss:$28 sps:$4 sm:$0xff]   ;;  %v6211_v4 = vld [vmem:[%s8336_s12 + $0x128] ss:$28 sps:$4 sm:$0xff]  }
 0x5fc   :  { %v6215_v5 = vld [vmem:[%s8336_s12 + $0x130] ss:$28 sps:$4 sm:$0xff]  }
 0x5fe   :  { %4398 = vmatpush1.bf16.msra.mxu0 %v6150_v8  ;;  %4480 = vmatpush1.bf16.msra.mxu1 %v6153_v10  ;;  %v6218_v8 = vld [vmem:[%s8336_s12 + $0x164] ss:$28 sps:$4 sm:$0xff]  }
 0x5ff   :  { %4399 = vmatprep.subr.bf16.mxu0 %v6158_v11  ;;  %4481 = vmatprep.subr.bf16.mxu1 %v6161_v12  ;;  %v6219_v10 = vld [vmem:[%s8336_s12 + $0x328] ss:$28 sps:$4 sm:$0xff]   ;;  %v6216_v11 = vld [vmem:[%s8336_s12 + $0x160] ss:$28 sps:$4 sm:$0xff]  }
 0x600   :  { %v6220_v12 = vld [vmem:[%s8336_s12 + $0x168] ss:$28 sps:$4 sm:$0xff]  }
 0x602   :  { %4400 = vmatpush1.bf16.msra.mxu0 %v6156_v13  ;;  %4482 = vmatpush1.bf16.msra.mxu1 %v6159_v14  ;;  %v6223_v13 = vld [vmem:[%s8336_s12 + $0x19c] ss:$28 sps:$4 sm:$0xff]  }
 0x603   :  { %4401 = vmatprep.subr.bf16.mxu0 %v6164_v17  ;;  %4483 = vmatprep.subr.bf16.mxu1 %v6167_v18  ;;  %v6224_v14 = vld [vmem:[%s8336_s12 + $0x360] ss:$28 sps:$4 sm:$0xff]   ;;  %v6221_v17 = vld [vmem:[%s8336_s12 + $0x198] ss:$28 sps:$4 sm:$0xff]  }
 0x604   :  { %v6225_v18 = vld [vmem:[%s8336_s12 + $0x1a0] ss:$28 sps:$4 sm:$0xff]  }
 0x606   :  { %4402 = vmatpush1.bf16.msra.mxu0 %v6162_v19  ;;  %4484 = vmatpush1.bf16.msra.mxu1 %v6165_v20  ;;  %v6228_v19 = vld [vmem:[%s8336_s12 + $0x1d4] ss:$28 sps:$4 sm:$0xff]  }
 0x607   :  { %4403 = vmatprep.subr.bf16.mxu0 %v6170_v21  ;;  %4485 = vmatprep.subr.bf16.mxu1 %v6173_v16  ;;  %v6229_v20 = vld [vmem:[%s8336_s12 + $0x558] ss:$28 sps:$4 sm:$0xff]   ;;  %v6226_v21 = vld [vmem:[%s8336_s12 + $0x1d0] ss:$28 sps:$4 sm:$0xff]  }
 0x608   :  { %v6230_v16 = vld [vmem:[%s8336_s12 + $0x398] ss:$28 sps:$4 sm:$0xff]  }
 0x60a   :  { %4404 = vmatpush1.bf16.msra.mxu0 %v6168_v22  ;;  %4486 = vmatpush1.bf16.msra.mxu1 %v6171_v23  ;;  %v6233_v22 = vld [vmem:[%s8336_s12 + $0x20c] ss:$28 sps:$4 sm:$0xff]  }
 0x60b   :  { %4405 = vmatprep.subr.bf16.mxu0 %v6176_v24  ;;  %4487 = vmatprep.subr.bf16.mxu1 %v6179_v25  ;;  %v6234_v23 = vld [vmem:[%s8336_s12 + $0x590] ss:$28 sps:$4 sm:$0xff]   ;;  %v6231_v24 = vld [vmem:[%s8336_s12 + $0x208] ss:$28 sps:$4 sm:$0xff]  }
 0x60c   :  { %v2876_v34 = vpop.f32.mrb[20].mxu1  ;;  %v6235_v25 = vld [vmem:[%s8336_s12 + $0x3d0] ss:$28 sps:$4 sm:$0xff]  }
 0x60d   :  { %v2877_v15 = vadd.f32 %v2876_v34, %v2472_v28  ;;  %v2878_v35 = vpop.f32.mrb[21].mxu1  ;;  %v6238_v28 = vld [vmem:[%s8336_s12 + $0x244] ss:$28 sps:$4 sm:$0xff]   ;;  %v6241_v34 = vld [vmem:[%s8336_s12 + $0x278] ss:$28 sps:$4 sm:$0xff]  }
 0x60e   :  { %v2879_v36 = vadd.f32 %v2878_v35, %v2476_v29  ;;  %v2880_v37 = vpop.f32.mrb[22].mxu1  ;;  %4406 = vmatpush1.bf16.msra.mxu0 %v6174_v2  ;;  %4488 = vmatpush1.bf16.msra.mxu1 %v6177_v31  ;;  %v6239_v29 = vld [vmem:[%s8336_s12 + $0x5c8] ss:$28 sps:$4 sm:$0xff]   ;;  %v6236_v2 = vld [vmem:[%s8336_s12 + $0x240] ss:$28 sps:$4 sm:$0xff]  }
 0x60f   :  { %v2885_v40 = vmax.f32 %v2877_v15, 0.0  ;;  %v2881_v41 = vpop.f32.mrb[23].mxu1  ;;  %4407 = vmatprep.subr.bf16.mxu0 %v6182_v32  ;;  %4489 = vmatprep.subr.bf16.mxu1 %v6185_v33  ;;  %v6240_v31 = vld [vmem:[%s8336_s12 + $0x408] ss:$28 sps:$4 sm:$0xff]   ;;  %v6243_v32 = vld [vmem:[%s8336_s12 + $0x27c] ss:$28 sps:$4 sm:$0xff]  }
 0x610   :  { %v2886_v44 = vmax.f32 %v2879_v36, 0.0  ;;  %v6244_v33 = vld [vmem:[%s8336_s12 + $0x600] ss:$28 sps:$4 sm:$0xff]   ;;  %v6248_v35 = vld [vmem:[%s8336_s12 + $0x2b4] ss:$28 sps:$4 sm:$0xff]  }
 0x611   :  { %v8000_v47 = vpack.c.bf16 %v2885_v40, %v2885_v40  ;;  %v6245_v15 = vld [vmem:[%s8336_s12 + $0x440] ss:$28 sps:$4 sm:$0xff]   ;;  %v6249_v36 = vld [vmem:[%s8336_s12 + $0x638] ss:$28 sps:$4 sm:$0xff]   ;;  %v6246_v37 = vld [vmem:[%s8336_s12 + $0x2b0] ss:$28 sps:$4 sm:$0xff]  }
 0x612   :  { %v7995_v45 = vpack.c.bf16 %v2886_v44, %v2886_v44  ;;  %4408 = vmatpush1.bf16.msra.mxu0 %v6180_v38  ;;  %4490 = vmatpush1.bf16.msra.mxu1 %v6183_v39  ;;  %v6250_v38 = vld [vmem:[%s8336_s12 + $0x478] ss:$28 sps:$4 sm:$0xff]   ;;  %v6253_v39 = vld [vmem:[%s8336_s12 + $0x2ec] ss:$28 sps:$4 sm:$0xff]  }
 0x613   :  { %4500 = vmatprep.subr.bf16.mxu0 %v6188_v42  ;;  %5376 = vmatprep.subr.bf16.mxu1 %v6189_v43  ;;  %v6254_v40 = vld [vmem:[%s8336_s12 + $0x670] ss:$28 sps:$4 sm:$0xff]   ;;  %v6251_v41 = vld [vmem:[%s8336_s12 + $0x2e8] ss:$28 sps:$4 sm:$0xff]  }
 0x614   :  { %4409 = vmatprep.mubr.bf16.mxu0 %v7995_v45  ;;  %4491 = vmatprep.mubr.bf16.mxu1 %v7995_v45  ;;  %v6255_v42 = vld [vmem:[%s8336_s12 + $0x4b0] ss:$28 sps:$4 sm:$0xff]   ;;  %v6258_v43 = vld [vmem:[%s8336_s12 + $0x324] ss:$28 sps:$4 sm:$0xff]  }
 0x615   :  { %4410 = vmatmul.mubr.bf16.vlgmr.msra.gmra.mrb[8].mxu0 %v8000_v47  ;;  %4492 = vmatmul.mubr.bf16.vlgmr.msra.gmra.mrb[24].mxu1 %v8000_v47  ;;  %v6259_v44 = vld [vmem:[%s8336_s12 + $0x6a8] ss:$28 sps:$4 sm:$0xff]  }
 0x616   :  { %4501 = vmatpush1.bf16.msra.mxu0 %v6186_v46  ;;  %4532 = vmatprep.mubr.bf16.mxu0 %v7791_v27  ;;  %v6256_v46 = vld [vmem:[%s8336_s12 + $0x320] ss:$28 sps:$4 sm:$0xff]  }
 0x617   :  { %5377 = vmatpush3.bf16.msra.mxu1 %v6190_v48  ;;  %4614 = vmatprep.mubr.bf16.mxu1 %v7791_v27  ;;  %v6200_v27 = vld [vmem:[%s8336_s12 + $0x88] ss:$28 sps:$4 sm:$0xff]  }
 0x618   :  { %4502 = vmatprep.subr.bf16.mxu0 %v6193_v49  ;;  %5378 = vmatprep.subr.bf16.mxu1 %v6194_v50  ;;  %v6260_v48 = vld [vmem:[%s8336_s12 + $0x4e8] ss:$28 sps:$4 sm:$0xff]   ;;  %v6263_v49 = vld [vmem:[%s8336_s12 + $0x35c] ss:$28 sps:$4 sm:$0xff]  }
 0x619   :  { %v6264_v50 = vld [vmem:[%s8336_s12 + $0x6e0] ss:$28 sps:$4 sm:$0xff]  }
 0x61a   :  { %4503 = vmatpush1.bf16.msra.mxu0 %v6191_v51  ;;  %v6261_v51 = vld [vmem:[%s8336_s12 + $0x358] ss:$28 sps:$4 sm:$0xff]  }
 0x61b   :  { %5379 = vmatpush3.bf16.msra.mxu1 %v6195_v52  ;;  %4504 = vmatprep.subr.bf16.mxu0 %v6198_v53  ;;  %v6265_v52 = vld [vmem:[%s8336_s12 + $0x520] ss:$28 sps:$4 sm:$0xff]   ;;  %v6268_v53 = vld [vmem:[%s8336_s12 + $0x394] ss:$28 sps:$4 sm:$0xff]  }
 0x61c   :  { %5380 = vmatprep.subr.bf16.mxu1 %v6199_v54  ;;  %v6266_v54 = vld [vmem:[%s8336_s12 + $0x390] ss:$28 sps:$4 sm:$0xff]  }
 0x61e   :  { %4505 = vmatpush1.bf16.msra.mxu0 %v6196_v55  ;;  %v6271_v55 = vld [vmem:[%s8336_s12 + $0x3cc] ss:$28 sps:$4 sm:$0xff]  }
 0x61f   :  { %5381 = vmatpush3.bf16.msra.mxu1 %v6200_v27  ;;  %4506 = vmatprep.subr.bf16.mxu0 %v6203_v56  ;;  %v6269_v27 = vld [vmem:[%s8336_s12 + $0x3c8] ss:$28 sps:$4 sm:$0xff]  }
 0x620   :  { %5382 = vmatprep.subr.bf16.mxu1 %v6204_v57  ;;  %v6274_v56 = vld [vmem:[%s8336_s12 + $0x404] ss:$28 sps:$4 sm:$0xff]  }
 0x621   :  { %v6272_v57 = vld [vmem:[%s8336_s12 + $0x400] ss:$28 sps:$4 sm:$0xff]  }
 0x622   :  { %4507 = vmatpush1.bf16.msra.mxu0 %v6201_v59  ;;  %v6280_v59 = vld [vmem:[%s8336_s12 + $0x474] ss:$28 sps:$4 sm:$0xff]  }
 0x623   :  { %5383 = vmatpush3.bf16.msra.mxu1 %v6205_v60  ;;  %4508 = vmatprep.subr.bf16.mxu0 %v6208_v61  ;;  %v6278_v60 = vld [vmem:[%s8336_s12 + $0x470] ss:$28 sps:$4 sm:$0xff]  }
 0x624   :  { %5384 = vmatprep.subr.bf16.mxu1 %v6209_v62  ;;  %v6283_v61 = vld [vmem:[%s8336_s12 + $0x4ac] ss:$28 sps:$4 sm:$0xff]  }
 0x625   :  { %v6281_v62 = vld [vmem:[%s8336_s12 + $0x4a8] ss:$28 sps:$4 sm:$0xff]  }
 0x626   :  { %4509 = vmatpush1.bf16.msra.mxu0 %v6206_v63  ;;  %v6286_v63 = vld [vmem:[%s8336_s12 + $0x4e4] ss:$28 sps:$4 sm:$0xff]  }
 0x627   :  { %5385 = vmatpush3.bf16.msra.mxu1 %v6210_v0  ;;  %4510 = vmatprep.subr.bf16.mxu0 %v6213_v1  ;;  %v6284_v0 = vld [vmem:[%s8336_s12 + $0x4e0] ss:$28 sps:$4 sm:$0xff]  }
 0x628   :  { %5386 = vmatprep.subr.bf16.mxu1 %v6214_v3  ;;  %v6289_v1 = vld [vmem:[%s8336_s12 + $0x51c] ss:$28 sps:$4 sm:$0xff]  }
 0x629   :  { %v6287_v3 = vld [vmem:[%s8336_s12 + $0x518] ss:$28 sps:$4 sm:$0xff]  }
 0x62a   :  { %4511 = vmatpush1.bf16.msra.mxu0 %v6211_v4  ;;  %v6292_v4 = vld [vmem:[%s8336_s12 + $0x554] ss:$28 sps:$4 sm:$0xff]  }
 0x62b   :  { %5387 = vmatpush3.bf16.msra.mxu1 %v6215_v5  ;;  %4512 = vmatprep.subr.bf16.mxu0 %v6218_v8  ;;  %v6290_v5 = vld [vmem:[%s8336_s12 + $0x550] ss:$28 sps:$4 sm:$0xff]  }
 0x62c   :  { %5388 = vmatprep.subr.bf16.mxu1 %v6219_v10  ;;  %v6295_v8 = vld [vmem:[%s8336_s12 + $0x58c] ss:$28 sps:$4 sm:$0xff]  }
 0x62d   :  { %v6293_v10 = vld [vmem:[%s8336_s12 + $0x588] ss:$28 sps:$4 sm:$0xff]  }
 0x62e   :  { %4513 = vmatpush1.bf16.msra.mxu0 %v6216_v11  ;;  %v6298_v11 = vld [vmem:[%s8336_s12 + $0x5c4] ss:$28 sps:$4 sm:$0xff]  }
 0x62f   :  { %5389 = vmatpush3.bf16.msra.mxu1 %v6220_v12  ;;  %4514 = vmatprep.subr.bf16.mxu0 %v6223_v13  ;;  %v6296_v12 = vld [vmem:[%s8336_s12 + $0x5c0] ss:$28 sps:$4 sm:$0xff]  }
 0x630   :  { %5390 = vmatprep.subr.bf16.mxu1 %v6224_v14  ;;  %v6301_v13 = vld [vmem:[%s8336_s12 + $0x5fc] ss:$28 sps:$4 sm:$0xff]  }
 0x631   :  { %v6299_v14 = vld [vmem:[%s8336_s12 + $0x5f8] ss:$28 sps:$4 sm:$0xff]  }
 0x632   :  { %4515 = vmatpush1.bf16.msra.mxu0 %v6221_v17  ;;  %v6304_v17 = vld [vmem:[%s8336_s12 + $0x634] ss:$28 sps:$4 sm:$0xff]  }
 0x633   :  { %5391 = vmatpush3.bf16.msra.mxu1 %v6225_v18  ;;  %4516 = vmatprep.subr.bf16.mxu0 %v6228_v19  ;;  %v6302_v18 = vld [vmem:[%s8336_s12 + $0x630] ss:$28 sps:$4 sm:$0xff]  }
 0x634   :  { %5398 = vmatprep.subr.bf16.mxu1 %v6229_v20  ;;  %v6307_v19 = vld [vmem:[%s8336_s12 + $0x66c] ss:$28 sps:$4 sm:$0xff]  }
 0x635   :  { %v6305_v20 = vld [vmem:[%s8336_s12 + $0x668] ss:$28 sps:$4 sm:$0xff]  }
 0x636   :  { %4615 = vmatmul.mubr.bf16.vlgmr.msra.gmra.mrb[28].mxu1 %v7799_v30  ;;  %4517 = vmatpush1.bf16.msra.mxu0 %v6226_v21  ;;  %v6310_v21 = vld [vmem:[%s8336_s12 + $0x6a4] ss:$28 sps:$4 sm:$0xff]  }
 0x637   :  { %5399 = vmatpush3.bf16.msra.mxu1 %v6230_v16  ;;  %4654 = vmatprep.mubr.bf16.mxu1 %v7995_v45  ;;  %v6308_v16 = vld [vmem:[%s8336_s12 + $0x6a0] ss:$28 sps:$4 sm:$0xff]  }
 0x638   :  { %4518 = vmatprep.subr.bf16.mxu0 %v6233_v22  ;;  %5400 = vmatprep.subr.bf16.mxu1 %v6234_v23  ;;  %v6313_v22 = vld [vmem:[%s8336_s12 + $0x6dc] ss:$28 sps:$4 sm:$0xff]  }
 0x639   :  { %v6311_v23 = vld [vmem:[%s8336_s12 + $0x6d8] ss:$28 sps:$4 sm:$0xff]  }
 0x63a   :  { %4519 = vmatpush1.bf16.msra.mxu0 %v6231_v24  ;;  %v8296_v24 = vld [vmem:[%s8337_s13] sm:$0x7f] }
 0x63b   :  { %5401 = vmatpush3.bf16.msra.mxu1 %v6235_v25  ;;  %4520 = vmatprep.subr.bf16.mxu0 %v6238_v28  ;;  %v3152_v25 = vrot.slane %v8296_v24, %v7213_v7  ;;  %v3160_v28 = vrot.slane %v8296_v24, %v7310_v58 }
 0x63c   :  { %5402 = vmatprep.subr.bf16.mxu1 %v6239_v29  ;;  %v3156_v29 = vrot.slane %v8296_v24, %v7221_v9 }
 0x63e   :  { %4521 = vmatpush1.bf16.msra.mxu0 %v6236_v2  ;;  %v3164_v2 = vrot.slane %v8296_v24, %v7236_v26 }
 0x63f   :  { %5403 = vmatpush3.bf16.msra.mxu1 %v6240_v31  ;;  %4522 = vmatprep.subr.bf16.mxu0 %v6243_v32 }
 0x640   :  { %5404 = vmatprep.subr.bf16.mxu1 %v6244_v33 }
 0x642   :  { %4523 = vmatpush1.bf16.msra.mxu0 %v6241_v34 }
 0x643   :  { %5405 = vmatpush3.bf16.msra.mxu1 %v6245_v15  ;;  %4524 = vmatprep.subr.bf16.mxu0 %v6248_v35 }
 0x644   :  { %5406 = vmatprep.subr.bf16.mxu1 %v6249_v36 }
 0x646   :  { %4525 = vmatpush1.bf16.msra.mxu0 %v6246_v37 }
 0x647   :  { %5407 = vmatpush3.bf16.msra.mxu1 %v6250_v38  ;;  %4526 = vmatprep.subr.bf16.mxu0 %v6253_v39 }
 0x648   :  { %5408 = vmatprep.subr.bf16.mxu1 %v6254_v40 }
 0x64a   :  { %4527 = vmatpush1.bf16.msra.mxu0 %v6251_v41 }
 0x64b   :  { %5409 = vmatpush3.bf16.msra.mxu1 %v6255_v42  ;;  %4528 = vmatprep.subr.bf16.mxu0 %v6258_v43 }
 0x64c   :  { %5410 = vmatprep.subr.bf16.mxu1 %v6259_v44 }
 0x64e   :  { %4529 = vmatpush1.bf16.msra.mxu0 %v6256_v46 }
 0x64f   :  { %5411 = vmatpush3.bf16.msra.mxu1 %v6260_v48  ;;  %4530 = vmatprep.subr.bf16.mxu0 %v6263_v49 }
 0x650   :  { %5412 = vmatprep.subr.bf16.mxu1 %v6264_v50 }
 0x652   :  { %4531 = vmatpush1.bf16.msra.mxu0 %v6261_v51 }
 0x653   :  { %5413 = vmatpush3.bf16.msra.mxu1 %v6265_v52  ;;  %4541 = vmatprep.subr.bf16.mxu0 %v6268_v53 }
 0x655   :  { %4533 = vmatmul.mubr.bf16.vlgmr.msra.gmra.mrb[12].mxu0 %v7799_v30  ;;  %v6277_v30 = vld [vmem:[%s8336_s12 + $0x43c] ss:$28 sps:$4 sm:$0xff]  }
 0x656   :  { %4655 = vmatmul.mubr.bf16.vlgmr.msra.gmra.mrb[32].mxu1 %v8000_v47  ;;  %4542 = vmatpush1.bf16.msra.mxu0 %v6266_v54 }
 0x657   :  { %4573 = vmatprep.mubr.bf16.mxu0 %v7995_v45  ;;  %4543 = vmatprep.subr.bf16.mxu0 %v6271_v55  ;;  %v6275_v45 = vld [vmem:[%s8336_s12 + $0x438] ss:$28 sps:$4 sm:$0xff]   ;;  %s6371_s12 = smov [#allocation2]  }
 0x658   :  { %s4746_s13 = sshll.u32 %s6371_s12, 4  ;;  %s4747_s13 = int_to_ptr.vmem [resolvable:$true] %s4746_s13 }
 0x659   :  { %s6345_s29 = scalar_lea.vmem %s4747_s13, 448  ;;  %p6350_p1 = scmp.lt.s32.totalorder %s4747_s13, %s4747_s13 }
 0x65a   :  { %4544 = vmatpush1.bf16.msra.mxu0 %v6269_v27  ;;  %p6346_p0 = scmp.ne.s32.totalorder %s4747_s13, %s6345_s29  ;;  %p6351_p2 = scmp.lt.s32.totalorder %s6345_s29, %s6345_s29 }
 0x65b   :  { %4545 = vmatprep.subr.bf16.mxu0 %v6274_v56 }
 0x65c   :  { %p6352_p3 = por %p6351_p2, %p6350_p1 }
 0x65e   :  { %4546 = vmatpush1.bf16.msra.mxu0 %v6272_v57  ;;  %p6353_p4 = pnand %p6352_p3, %p6346_p0 }
 0x65f   :  { %4547 = vmatprep.subr.bf16.mxu0 %v6277_v30 }
 0x662   :  { %4548 = vmatpush1.bf16.msra.mxu0 %v6275_v45 }
 0x663   :  { %4549 = vmatprep.subr.bf16.mxu0 %v6280_v59 }
 0x666   :  { %4550 = vmatpush1.bf16.msra.mxu0 %v6278_v60  ;;  %v3175_v60 = vsub.s32 6, %v7210_v6 }
 0x667   :  { %4551 = vmatprep.subr.bf16.mxu0 %v6283_v61 }
 0x668   :  { %v3176_v61 = vrot.slane %v8296_v24, %v3175_v60 }
 0x66a   :  { %4552 = vmatpush1.bf16.msra.mxu0 %v6281_v62 }
 0x66b   :  { %4553 = vmatprep.subr.bf16.mxu0 %v6286_v63 }
 0x66e   :  { %4554 = vmatpush1.bf16.msra.mxu0 %v6284_v0 }
 0x66f   :  { %4555 = vmatprep.subr.bf16.mxu0 %v6289_v1 }
 0x672   :  { %4556 = vmatpush1.bf16.msra.mxu0 %v6287_v3 }
 0x673   :  { %4557 = vmatprep.subr.bf16.mxu0 %v6292_v4 }
 0x676   :  { %4558 = vmatpush1.bf16.msra.mxu0 %v6290_v5 }
 0x677   :  { %4559 = vmatprep.subr.bf16.mxu0 %v6295_v8 }
 0x67a   :  { %4560 = vmatpush1.bf16.msra.mxu0 %v6293_v10 }
 0x67b   :  { %4561 = vmatprep.subr.bf16.mxu0 %v6298_v11 }
 0x67e   :  { %4562 = vmatpush1.bf16.msra.mxu0 %v6296_v12 }
 0x67f   :  { %4563 = vmatprep.subr.bf16.mxu0 %v6301_v13 }
 0x682   :  { %4564 = vmatpush1.bf16.msra.mxu0 %v6299_v14  ;;  %v3167_v14 = vsub.s32 4, %v7210_v6 }
 0x683   :  { %4565 = vmatprep.subr.bf16.mxu0 %v6304_v17  ;;  %v3171_v17 = vsub.s32 5, %v7210_v6 }
 0x686   :  { %4566 = vmatpush1.bf16.msra.mxu0 %v6302_v18  ;;  %v3168_v18 = vrot.slane %v8296_v24, %v3167_v14 }
 0x687   :  { %4567 = vmatprep.subr.bf16.mxu0 %v6307_v19  ;;  %v3172_v19 = vrot.slane %v8296_v24, %v3171_v17 }
 0x68a   :  { %4568 = vmatpush1.bf16.msra.mxu0 %v6305_v20 }
 0x68b   :  { %4569 = vmatprep.subr.bf16.mxu0 %v6310_v21 }
 0x68e   :  { %4570 = vmatpush1.bf16.msra.mxu0 %v6308_v16 }
 0x68f   :  { %4571 = vmatprep.subr.bf16.mxu0 %v6313_v22 }
 0x692   :  { %4572 = vmatpush1.bf16.msra.mxu0 %v6311_v23 }
 0x695   :  { %4574 = vmatmul.mubr.bf16.vlgmr.msra.gmra.mrb[12].mxu0 %v8000_v47 }
 0x6e8   :  { %v4411_v31 = vpop.f32.mrb[8].mxu0  ;;  %v4493_v32 = vpop.f32.mrb[24].mxu1 }
 0x6e9   :  { %v5428_v47 = vadd.f32 %v4411_v31, %v3152_v25  ;;  %v5430_v33 = vadd.f32 %v4493_v32, %v3160_v28  ;;  %v4413_v34 = vpop.f32.mrb[9].mxu0  ;;  %v4495_v15 = vpop.f32.mrb[25].mxu1 }
 0x6ea   :  { %v5429_v35 = vadd.f32 %v4413_v34, %v3156_v29  ;;  %v5431_v36 = vadd.f32 %v4495_v15, %v3164_v2  ;;  %v4415_v37 = vpop.f32.mrb[10].mxu0  ;;  %v4497_v38 = vpop.f32.mrb[26].mxu1 }
 0x6eb   :  { %v5339_v7 = vmul.f32 -1.442695, %v5428_v47  ;;  %v5341_v39 = vmul.f32 -1.442695, %v5430_v33  ;;  %v4416_v40 = vpop.f32.mrb[11].mxu0  ;;  %v4498_v58 = vpop.f32.mrb[27].mxu1 }
 0x6ec   :  { %v5340_v41 = vmul.f32 -1.442695, %v5429_v35  ;;  %v5342_v42 = vmul.f32 -1.442695, %v5431_v36 }
 0x6ed   :  { %6316 = vpow2.f32 %v5339_v7 }
 0x6ee   :  { %6318 = vpow2.f32 %v5341_v39 }
 0x6ef   :  { %6320 = vpow2.f32 %v5340_v41 }
 0x6f0   :  { %6322 = vpow2.f32 %v5342_v42 }
 0x6f7   :  { %v6317_v9 = vpop.eup %6316 }
 0x6f8   :  { %v6319_v26 = vpop.eup %6318  ;;  %v4683_v43 = vadd.f32 1.0, %v6317_v9 }
 0x6f9   :  { %v6321_v44 = vpop.eup %6320  ;;  %v4685_v46 = vadd.f32 1.0, %v6319_v26 }
 0x6fa   :  { %v6323_v48 = vpop.eup %6322  ;;  %6324 = vrcp.f32 %v4683_v43  ;;  %v4684_v49 = vadd.f32 1.0, %v6321_v44 }
 0x6fb   :  { %6326 = vrcp.f32 %v4685_v46  ;;  %v4686_v50 = vadd.f32 1.0, %v6323_v48 }
 0x6fc   :  { %6328 = vrcp.f32 %v4684_v49 }
 0x6fd   :  { %6330 = vrcp.f32 %v4686_v50 }
 0x704   :  { %v6325_v51 = vpop.eup %6324 }
 0x705   :  { %v6327_v52 = vpop.eup %6326 }
 0x706   :  { %v6329_v53 = vpop.eup %6328 }
 0x707   :  { %v6331_v54 = vpop.eup %6330  ;;  %v5350_v55 = vpack.c.bf16 %v6329_v53, %v6325_v51 }
 0x708   :  { %v5351_v27 = vpack.c.bf16 %v6331_v54, %v6327_v52 }
 0x709   :  { %v5392_v56 = vpop.f32.mrb[28].mxu1  ;;  %4733 = vst [vmem:[#allocation2] sm:$0xff] %v5350_v55 }
 0x70a   :  { %v5393_v57 = vpop.f32.mrb[29].mxu1  ;;  %4734 = vst [vmem:[#allocation2 + $0x8] sm:$0xff] %v5351_v27 }
 0x70b   :  { %v5394_v30 = vadd.f32 %v5393_v57, %v5392_v56  ;;  %v5395_v45 = vpop.f32.mrb[30].mxu1 }
 0x70c   :  { %v5396_v59 = vpop.f32.mrb[31].mxu1 }
 0x70d   :  { %v4617_v0 = vadd.f32 %v5394_v30, %v3176_v61 }
 0x729   :  { %v5414_v62 = vpop.f32.mrb[32].mxu1 }
 0x72a   :  { %v5415_v63 = vpop.f32.mrb[33].mxu1 }
 0x72b   :  { %v5416_v1 = vadd.f32 %v5415_v63, %v5414_v62  ;;  %v5417_v3 = vpop.f32.mrb[34].mxu1 }
 0x72c   :  { %v5418_v4 = vpop.f32.mrb[35].mxu1 }
 0x72d   :  { %v4657_v5 = vadd.f32 %v5416_v1, %v4617_v0 }
 0x72f   :  { %v5345_v8 = vmul.f32 -1.442695, %v4657_v5 }
 0x731   :  { %6332 = vpow2.f32 %v5345_v8 }
 0x73b   :  { %v6333_v10 = vpop.eup %6332 }
 0x73c   :  { %v4689_v11 = vadd.f32 1.0, %v6333_v10 }
 0x73e   :  { %6334 = vrcp.f32 %v4689_v11 }
 0x748   :  { %v6335_v12 = vpop.eup %6334 }
 0x749   :  { %v5353_v13 = vpack.c.bf16 %v6335_v12, %v6335_v12 }
 0x74b   :  { %4737 = vst.msk [vmem:[#allocation2 + $0x18] sm:$0xf] %vm4736_vm2, %v5353_v13 }
 0x768   :  { %v4575_v20 = vpop.f32.mrb[12].mxu0 }
 0x769   :  { %v5432_v21 = vadd.f32 %v4575_v20, %v3168_v18  ;;  %v4577_v16 = vpop.f32.mrb[13].mxu0 }
 0x76a   :  { %v5433_v22 = vadd.f32 %v4577_v16, %v3172_v19  ;;  %v4579_v23 = vpop.f32.mrb[14].mxu0 }
 0x76b   :  { %v5343_v25 = vmul.f32 -1.442695, %v5432_v21  ;;  %v4580_v28 = vpop.f32.mrb[15].mxu0 }
 0x76c   :  { %v5344_v29 = vmul.f32 -1.442695, %v5433_v22 }
 0x76d   :  { %6336 = vpow2.f32 %v5343_v25 }
 0x76e   :  { %6338 = vpow2.f32 %v5344_v29 }
 0x777   :  { %v6337_v2 = vpop.eup %6336 }
 0x778   :  { %v6339_v31 = vpop.eup %6338  ;;  %v4687_v32 = vadd.f32 1.0, %v6337_v2 }
 0x779   :  { %v4688_v47 = vadd.f32 1.0, %v6339_v31 }
 0x77a   :  { %6340 = vrcp.f32 %v4687_v32 }
 0x77b   :  { %6342 = vrcp.f32 %v4688_v47 }
 0x784   :  { %v6341_v6 = vpop.eup %6340 }
 0x785   :  { %v6343_v24 = vpop.eup %6342 }
 0x786   :  { %v5352_v33 = vpack.c.bf16 %v6343_v24, %v6341_v6 }
 0x788   :  { %4735 = vst [vmem:[#allocation2 + $0x10] sm:$0xff] %v5352_v33 }
 0x789   :  { %6356 = shalt.err (!%p6353_p4)
}
 0x78a   :  { %s6357_s16 = scalar_lea.hbm %s8339_s15, 448 }
 0x78b   :  { %p6358_p5 = scmp.ne.s32.totalorder %s8339_s15, %s6357_s16  ;;  %p6361_p6 = scmp.lt.u32.totalorder %s6357_s16, %s8339_s15 }
 0x78d   :  { %p6363_p7 = pnand %p6361_p6, %p6358_p5 }
 0x78f   :  { %6366 = shalt.err (!%p6363_p7)
}
 0x790   :  { %4749 = dma.vmem_to_hbm [thread:$0]  %s4747_s13, 448, %s8339_s15, [#allocation3]  }
 0x791   :  { %6367 = dma.done.wait [#allocation3], 448  }
 0x792   :  { %6368 = vsyncadd [#allocation3], 4294966848 }
 0x793   :  { %4755 = vsyncpa [#allocation3], 1 }

</bundles_post_ra>
